<compile_context>
chip_gen: v7x
topology: tpu7x:2x2x1
jax: 0.10.0
libtpu: 0.0.40
codegen_flags: <defaults>
</compile_context>

<pallas_src>
import functools
import math

import jax
import jax.numpy as jnp
from jax.experimental import pallas as pl
from jax.experimental.pallas import tpu as pltpu  # noqa: F401  (TPU backend)

# ------------------------- small (toy) configuration ----------------------
VOCAB = 128        # vocab size        (camembert-base: 32005)
H = 128            # hidden size       (camembert-base: 768)
HEADS = 2          # attention heads   (camembert-base: 12)
DH = H // HEADS    # head dim
FF = 256           # intermediate size (camembert-base: 3072)
LAYERS = 2         # encoder layers    (camembert-base: 12)
NB_CLASS = 5       # multilabel classes
MAX_POS = 32       # position table    (camembert-base: 514)
PAD_IDX = 1        # RoBERTa/Camembert padding idx -> positions start at 2
LN_EPS = 1e-5
B, S = 2, 8        # batch, sequence length


# ----------------------------- kernel helpers -----------------------------
def _mm(a, b):
    """a @ b on the MXU: bf16 inputs, f32 accumulation."""
    return jax.lax.dot_general(
        a.astype(jnp.bfloat16), b.astype(jnp.bfloat16),
        dimension_numbers=(((a.ndim - 1,), (0,)), ((), ())),
        preferred_element_type=jnp.float32)


def _mm_t(a, b):
    """a @ b.T expressed directly (contract last dims), no layout transpose."""
    return jax.lax.dot_general(
        a.astype(jnp.bfloat16), b.astype(jnp.bfloat16),
        dimension_numbers=(((1,), (1,)), ((), ())),
        preferred_element_type=jnp.float32)


def _layer_norm(x, g, b):
    mu = jnp.mean(x, axis=-1, keepdims=True)
    var = jnp.mean((x - mu) ** 2, axis=-1, keepdims=True)
    return (x - mu) * jax.lax.rsqrt(var + LN_EPS) * g + b


# ------------------------------ fused kernel ------------------------------
def _model_kernel(emb_ref, bias_ref, emb_g_ref, emb_b_ref,
                  wqkv_ref, bqkv_ref, wo_ref, bo_ref,
                  ln1_g_ref, ln1_b_ref,
                  w1_ref, b1_ref, w2_ref, b2_ref,
                  ln2_g_ref, ln2_b_ref,
                  pre_w_ref, pre_b_ref, cls_w_ref, cls_b_ref,
                  logits_ref, *, batch, seq):
    scale = 1.0 / math.sqrt(DH)
    bias = bias_ref[...]                                     # (B, S) additive mask

    # Embedding LayerNorm (no dead zero-residual). Dropout: eval identity.
    x = _layer_norm(emb_ref[...].astype(jnp.float32),
                    emb_g_ref[...], emb_b_ref[...])          # (B*S, H)

    for l in range(LAYERS):                                  # fully unrolled
        # ---- fused Q/K/V projection: one (B*S, H) @ (H, 3H) matmul --------
        qkv = _mm(x, wqkv_ref[l]) + bqkv_ref[l]              # (B*S, 3H)

        # ---- attention, unrolled over the tiny (batch, head) slices -------
        ctx_rows = []
        for b in range(batch):
            bias_b = bias[b:b + 1, :]                        # (1, S)
            rows = slice(b * seq, (b + 1) * seq)
            head_outs = []
            for h in range(HEADS):
                q = qkv[rows, h * DH:(h + 1) * DH]                       # (S, DH)
                k = qkv[rows, H + h * DH:H + (h + 1) * DH]               # (S, DH)
                v = qkv[rows, 2 * H + h * DH:2 * H + (h + 1) * DH]       # (S, DH)
                s = _mm_t(q, k) * scale + bias_b                         # (S, S)
                s = s - jnp.max(s, axis=-1, keepdims=True)
                p = jnp.exp(s)
                p = p * pl.reciprocal(jnp.sum(p, axis=-1, keepdims=True),
                                      approx=True)
                head_outs.append(_mm(p, v))                              # (S, DH)
            ctx_rows.append(jnp.concatenate(head_outs, axis=-1))         # (S, H)
        ctx = jnp.concatenate(ctx_rows, axis=0)                          # (B*S, H)

        # ---- output projection + residual LayerNorm (post-LN) -------------
        attn_out = _mm(ctx, wo_ref[l]) + bo_ref[l]
        x = _layer_norm(attn_out + x, ln1_g_ref[l], ln1_b_ref[l])

        # ---- feed-forward --------------------------------------------------
        # TODO(synk): HF camembert uses exact erf-GELU; tanh approximation is
        # used here for guaranteed Mosaic elementwise lowering.
        ff = jax.nn.gelu(_mm(x, w1_ref[l]) + b1_ref[l], approximate=True)
        ff = _mm(ff, w2_ref[l]) + b2_ref[l]
        x = _layer_norm(ff + x, ln2_g_ref[l], ln2_b_ref[l])

    # ---- classification head: CLS token -> tanh linear -> classifier ------
    cls_rows = jnp.concatenate(
        [x[b * seq:b * seq + 1, :] for b in range(batch)], axis=0)       # (B, H)
    pooled = jnp.tanh(_mm(cls_rows, pre_w_ref[...]) + pre_b_ref[...])
    # self.dropout(p=0.1): identity in eval mode.
    logits = _mm(pooled, cls_w_ref[...]) + cls_b_ref[...]                # (B, C)
    logits_ref[...] = logits.astype(logits_ref.dtype)


# ------------------------------ parameters --------------------------------
def init_params(key):
    keys = iter(jax.random.split(key, 32))

    def nrm(shape, dtype=jnp.bfloat16):
        return (jax.random.normal(next(keys), shape, jnp.float32) * 0.02
                ).astype(dtype)

    def zeros(shape):
        return jnp.zeros(shape, jnp.float32)

    def ones(shape):
        return jnp.ones(shape, jnp.float32)

    return {
        # embeddings stay f32 (gathered outside the kernel)
        "word_emb": nrm((VOCAB, H), jnp.float32),
        "pos_emb": nrm((MAX_POS, H), jnp.float32),
        "tok_emb": nrm((1, H), jnp.float32),
        "emb_ln_g": ones((1, H)), "emb_ln_b": zeros((1, H)),
        # per-layer weights, stacked on a leading layer axis, stored
        # pre-transposed as (in_features, out_features) in bf16.
        "wqkv": nrm((LAYERS, H, 3 * H)), "bqkv": zeros((LAYERS, 1, 3 * H)),
        "wo": nrm((LAYERS, H, H)), "bo": zeros((LAYERS, 1, H)),
        "ln1_g": jnp.ones((LAYERS, 1, H), jnp.float32),
        "ln1_b": zeros((LAYERS, 1, H)),
        "w1": nrm((LAYERS, H, FF)), "b1": zeros((LAYERS, 1, FF)),
        "w2": nrm((LAYERS, FF, H)), "b2": zeros((LAYERS, 1, H)),
        "ln2_g": jnp.ones((LAYERS, 1, H), jnp.float32),
        "ln2_b": zeros((LAYERS, 1, H)),
        # classification head (explicit part of the PyTorch module)
        "pre_w": nrm((H, H)), "pre_b": zeros((1, H)),
        "cls_w": nrm((H, NB_CLASS)), "cls_b": zeros((1, NB_CLASS)),
    }


# ------------------------------ forward pass -------------------------------
def camembert_multilabel_forward(params, input_ids, attention_mask):
    Bn, Sn = input_ids.shape
    mask_i = attention_mask.astype(jnp.int32)

    # RoBERTa-style position ids: cumsum(mask)*mask + padding_idx.
    position_ids = jnp.cumsum(mask_i, axis=1) * mask_i + PAD_IDX

    # Embedding gathers (plain-JAX glue); everything else is in the kernel.
    emb = (params["word_emb"][input_ids]
           + params["pos_emb"][position_ids]
           + params["tok_emb"][0][None, None, :]).astype(jnp.float32)
    emb = emb.reshape(Bn * Sn, H)

    # Extended attention mask: (1 - mask) * -10000, broadcast inside kernel.
    bias = (1.0 - attention_mask.astype(jnp.float32)) * -10000.0        # (B, S)

    kern = functools.partial(_model_kernel, batch=Bn, seq=Sn)
    return pl.pallas_call(
        kern,
        out_shape=jax.ShapeDtypeStruct((Bn, NB_CLASS), jnp.float32),
    )(emb, bias,
      params["emb_ln_g"], params["emb_ln_b"],
      params["wqkv"], params["bqkv"], params["wo"], params["bo"],
      params["ln1_g"], params["ln1_b"],
      params["w1"], params["b1"], params["w2"], params["b2"],
      params["ln2_g"], params["ln2_b"],
      params["pre_w"], params["pre_b"], params["cls_w"], params["cls_b"])


# --------------------------------- main ------------------------------------
if __name__ == "__main__":
    key = jax.random.PRNGKey(0)
    pkey, ikey = jax.random.split(key)
    params = init_params(pkey)

    input_ids = jax.random.randint(ikey, (B, S), 0, VOCAB, dtype=jnp.int32)
    attention_mask = jnp.ones((B, S), dtype=jnp.int32).at[1, 6:].set(0)

    fwd = jax.jit(camembert_multilabel_forward)
    logits = jax.block_until_ready(fwd(params, input_ids, attention_mask))
    assert logits.shape == (B, NB_CLASS)
    assert bool(jnp.all(jnp.isfinite(logits)))
    print("KERNEL_OK")
</pallas_src>

<mosaic_0001>
module attributes {stable_mosaic.version = 11 : i64} {
  func.func @_model_kernel(%arg0: memref<16x128xf32, #tpu.memory_space<vmem>>, %arg1: memref<2x8xf32, #tpu.memory_space<vmem>>, %arg2: memref<1x128xf32, #tpu.memory_space<vmem>>, %arg3: memref<1x128xf32, #tpu.memory_space<vmem>>, %arg4: memref<2x128x384xbf16, #tpu.memory_space<vmem>>, %arg5: memref<2x1x384xf32, #tpu.memory_space<vmem>>, %arg6: memref<2x128x128xbf16, #tpu.memory_space<vmem>>, %arg7: memref<2x1x128xf32, #tpu.memory_space<vmem>>, %arg8: memref<2x1x128xf32, #tpu.memory_space<vmem>>, %arg9: memref<2x1x128xf32, #tpu.memory_space<vmem>>, %arg10: memref<2x128x256xbf16, #tpu.memory_space<vmem>>, %arg11: memref<2x1x256xf32, #tpu.memory_space<vmem>>, %arg12: memref<2x256x128xbf16, #tpu.memory_space<vmem>>, %arg13: memref<2x1x128xf32, #tpu.memory_space<vmem>>, %arg14: memref<2x1x128xf32, #tpu.memory_space<vmem>>, %arg15: memref<2x1x128xf32, #tpu.memory_space<vmem>>, %arg16: memref<128x128xbf16, #tpu.memory_space<vmem>>, %arg17: memref<1x128xf32, #tpu.memory_space<vmem>>, %arg18: memref<128x5xbf16, #tpu.memory_space<vmem>>, %arg19: memref<1x5xf32, #tpu.memory_space<vmem>>, %arg20: memref<2x5xf32, #tpu.memory_space<vmem>>) attributes {dimension_semantics = [], scalar_prefetch = 0 : i64, scratch_operands = 0 : i64, tpu.core_type = #tpu.core_type<tc>} {
    %c0 = arith.constant 0 : index
    %c0_0 = arith.constant 0 : index
    %0 = vector.load %arg1[%c0, %c0_0] : memref<2x8xf32, #tpu.memory_space<vmem>>, vector<2x8xf32>
    %c0_1 = arith.constant 0 : index
    %c0_2 = arith.constant 0 : index
    %1 = vector.load %arg0[%c0_1, %c0_2] : memref<16x128xf32, #tpu.memory_space<vmem>>, vector<16x128xf32>
    %c0_3 = arith.constant 0 : index
    %c0_4 = arith.constant 0 : index
    %2 = vector.load %arg2[%c0_3, %c0_4] : memref<1x128xf32, #tpu.memory_space<vmem>>, vector<1x128xf32>
    %c0_5 = arith.constant 0 : index
    %c0_6 = arith.constant 0 : index
    %3 = vector.load %arg3[%c0_5, %c0_6] : memref<1x128xf32, #tpu.memory_space<vmem>>, vector<1x128xf32>
    %cst = arith.constant dense<0.000000e+00> : vector<16xf32>
    %4 = vector.multi_reduction <add>, %1, %cst [1] : vector<16x128xf32> to vector<16xf32>
    %5 = vector.shape_cast %4 : vector<16xf32> to vector<16x1xf32>
    %cst_7 = arith.constant 1.280000e+02 : f32
    %6 = vector.broadcast %cst_7 : f32 to vector<16x1xf32>
    %7 = arith.divf %5, %6 : vector<16x1xf32>
    %8 = vector.broadcast %7 : vector<16x1xf32> to vector<16x128xf32>
    %9 = arith.subf %1, %8 : vector<16x128xf32>
    %10 = arith.mulf %9, %9 : vector<16x128xf32>
    %cst_8 = arith.constant dense<0.000000e+00> : vector<16xf32>
    %11 = vector.multi_reduction <add>, %10, %cst_8 [1] : vector<16x128xf32> to vector<16xf32>
    %12 = vector.shape_cast %11 : vector<16xf32> to vector<16x1xf32>
    %cst_9 = arith.constant 1.280000e+02 : f32
    %13 = vector.broadcast %cst_9 : f32 to vector<16x1xf32>
    %14 = arith.divf %12, %13 : vector<16x1xf32>
    %15 = vector.broadcast %7 : vector<16x1xf32> to vector<16x128xf32>
    %16 = arith.subf %1, %15 : vector<16x128xf32>
    %cst_10 = arith.constant 9.99999974E-6 : f32
    %17 = vector.broadcast %cst_10 : f32 to vector<16x1xf32>
    %18 = arith.addf %14, %17 : vector<16x1xf32>
    %19 = math.rsqrt %18 : vector<16x1xf32>
    %20 = vector.broadcast %19 : vector<16x1xf32> to vector<16x128xf32>
    %21 = arith.mulf %16, %20 : vector<16x128xf32>
    %22 = vector.broadcast %2 : vector<1x128xf32> to vector<16x128xf32>
    %23 = arith.mulf %21, %22 : vector<16x128xf32>
    %24 = vector.broadcast %3 : vector<1x128xf32> to vector<16x128xf32>
    %25 = arith.addf %23, %24 : vector<16x128xf32>
    %c0_11 = arith.constant 0 : index
    %c0_12 = arith.constant 0 : index
    %c0_13 = arith.constant 0 : index
    %26 = vector.load %arg4[%c0_11, %c0_12, %c0_13] : memref<2x128x384xbf16, #tpu.memory_space<vmem>>, vector<1x128x384xbf16>
    %27 = vector.shape_cast %26 : vector<1x128x384xbf16> to vector<128x384xbf16>
    %28 = arith.truncf %25 : vector<16x128xf32> to vector<16x128xbf16>
    %cst_14 = arith.constant dense<0.000000e+00> : vector<16x384xf32>
    %29 = tpu.matmul %28, %27, %cst_14 {dimension_numbers = #tpu.dot_dimension_numbers<[1], [0], [0], [1], [0, 0, 1, 1], [], []>} : vector<16x128xbf16>, vector<128x384xbf16>, vector<16x384xf32> -> vector<16x384xf32>
    %c0_15 = arith.constant 0 : index
    %c0_16 = arith.constant 0 : index
    %c0_17 = arith.constant 0 : index
    %30 = vector.load %arg5[%c0_15, %c0_16, %c0_17] : memref<2x1x384xf32, #tpu.memory_space<vmem>>, vector<1x1x384xf32>
    %31 = vector.shape_cast %30 : vector<1x1x384xf32> to vector<1x384xf32>
    %32 = vector.broadcast %31 : vector<1x384xf32> to vector<16x384xf32>
    %33 = arith.addf %29, %32 : vector<16x384xf32>
    %34 = vector.extract_strided_slice %0 {offsets = [0, 0], sizes = [1, 8], strides = [1, 1]} : vector<2x8xf32> to vector<1x8xf32>
    %35 = vector.extract_strided_slice %33 {offsets = [0, 0], sizes = [8, 64], strides = [1, 1]} : vector<16x384xf32> to vector<8x64xf32>
    %36 = vector.extract_strided_slice %33 {offsets = [0, 128], sizes = [8, 64], strides = [1, 1]} : vector<16x384xf32> to vector<8x64xf32>
    %37 = vector.extract_strided_slice %33 {offsets = [0, 256], sizes = [8, 64], strides = [1, 1]} : vector<16x384xf32> to vector<8x64xf32>
    %38 = arith.truncf %35 : vector<8x64xf32> to vector<8x64xbf16>
    %39 = arith.truncf %36 : vector<8x64xf32> to vector<8x64xbf16>
    %cst_18 = arith.constant dense<0.000000e+00> : vector<8x8xf32>
    %40 = tpu.matmul %38, %39, %cst_18 {dimension_numbers = #tpu.dot_dimension_numbers<[1], [1], [0], [0], [0, 0, 1, 0], [], []>} : vector<8x64xbf16>, vector<8x64xbf16>, vector<8x8xf32> -> vector<8x8xf32>
    %cst_19 = arith.constant 1.250000e-01 : f32
    %41 = vector.broadcast %cst_19 : f32 to vector<8x8xf32>
    %42 = arith.mulf %40, %41 : vector<8x8xf32>
    %43 = vector.broadcast %34 : vector<1x8xf32> to vector<8x8xf32>
    %44 = arith.addf %42, %43 : vector<8x8xf32>
    %cst_20 = arith.constant dense<0xFF800000> : vector<8xf32>
    %45 = vector.multi_reduction <maximumf>, %44, %cst_20 [1] : vector<8x8xf32> to vector<8xf32>
    %46 = vector.shape_cast %45 : vector<8xf32> to vector<8x1xf32>
    %47 = vector.broadcast %46 : vector<8x1xf32> to vector<8x8xf32>
    %48 = arith.subf %44, %47 : vector<8x8xf32>
    %49 = math.exp %48 : vector<8x8xf32>
    %cst_21 = arith.constant dense<0.000000e+00> : vector<8xf32>
    %50 = vector.multi_reduction <add>, %49, %cst_21 [1] : vector<8x8xf32> to vector<8xf32>
    %51 = vector.shape_cast %50 : vector<8xf32> to vector<8x1xf32>
    %52 = tpu.reciprocal %51 {approx = true} : vector<8x1xf32> -> vector<8x1xf32>
    %53 = vector.broadcast %52 : vector<8x1xf32> to vector<8x8xf32>
    %54 = arith.mulf %49, %53 : vector<8x8xf32>
    %55 = arith.truncf %54 : vector<8x8xf32> to vector<8x8xbf16>
    %56 = arith.truncf %37 : vector<8x64xf32> to vector<8x64xbf16>
    %cst_22 = arith.constant dense<0.000000e+00> : vector<8x64xf32>
    %57 = tpu.matmul %55, %56, %cst_22 {dimension_numbers = #tpu.dot_dimension_numbers<[1], [0], [0], [1], [0, 0, 1, 1], [], []>} : vector<8x8xbf16>, vector<8x64xbf16>, vector<8x64xf32> -> vector<8x64xf32>
    %58 = vector.extract_strided_slice %33 {offsets = [0, 64], sizes = [8, 64], strides = [1, 1]} : vector<16x384xf32> to vector<8x64xf32>
    %59 = vector.extract_strided_slice %33 {offsets = [0, 192], sizes = [8, 64], strides = [1, 1]} : vector<16x384xf32> to vector<8x64xf32>
    %60 = vector.extract_strided_slice %33 {offsets = [0, 320], sizes = [8, 64], strides = [1, 1]} : vector<16x384xf32> to vector<8x64xf32>
    %61 = arith.truncf %58 : vector<8x64xf32> to vector<8x64xbf16>
    %62 = arith.truncf %59 : vector<8x64xf32> to vector<8x64xbf16>
    %cst_23 = arith.constant dense<0.000000e+00> : vector<8x8xf32>
    %63 = tpu.matmul %61, %62, %cst_23 {dimension_numbers = #tpu.dot_dimension_numbers<[1], [1], [0], [0], [0, 0, 1, 0], [], []>} : vector<8x64xbf16>, vector<8x64xbf16>, vector<8x8xf32> -> vector<8x8xf32>
    %cst_24 = arith.constant 1.250000e-01 : f32
    %64 = vector.broadcast %cst_24 : f32 to vector<8x8xf32>
    %65 = arith.mulf %63, %64 : vector<8x8xf32>
    %66 = vector.broadcast %34 : vector<1x8xf32> to vector<8x8xf32>
    %67 = arith.addf %65, %66 : vector<8x8xf32>
    %cst_25 = arith.constant dense<0xFF800000> : vector<8xf32>
    %68 = vector.multi_reduction <maximumf>, %67, %cst_25 [1] : vector<8x8xf32> to vector<8xf32>
    %69 = vector.shape_cast %68 : vector<8xf32> to vector<8x1xf32>
    %70 = vector.broadcast %69 : vector<8x1xf32> to vector<8x8xf32>
    %71 = arith.subf %67, %70 : vector<8x8xf32>
    %72 = math.exp %71 : vector<8x8xf32>
    %cst_26 = arith.constant dense<0.000000e+00> : vector<8xf32>
    %73 = vector.multi_reduction <add>, %72, %cst_26 [1] : vector<8x8xf32> to vector<8xf32>
    %74 = vector.shape_cast %73 : vector<8xf32> to vector<8x1xf32>
    %75 = tpu.reciprocal %74 {approx = true} : vector<8x1xf32> -> vector<8x1xf32>
    %76 = vector.broadcast %75 : vector<8x1xf32> to vector<8x8xf32>
    %77 = arith.mulf %72, %76 : vector<8x8xf32>
    %78 = arith.truncf %77 : vector<8x8xf32> to vector<8x8xbf16>
    %79 = arith.truncf %60 : vector<8x64xf32> to vector<8x64xbf16>
    %cst_27 = arith.constant dense<0.000000e+00> : vector<8x64xf32>
    %80 = tpu.matmul %78, %79, %cst_27 {dimension_numbers = #tpu.dot_dimension_numbers<[1], [0], [0], [1], [0, 0, 1, 1], [], []>} : vector<8x8xbf16>, vector<8x64xbf16>, vector<8x64xf32> -> vector<8x64xf32>
    %81 = tpu.concatenate %57, %80 in 1 : vector<8x64xf32>, vector<8x64xf32> -> vector<8x128xf32>
    %82 = vector.extract_strided_slice %0 {offsets = [1, 0], sizes = [1, 8], strides = [1, 1]} : vector<2x8xf32> to vector<1x8xf32>
    %83 = vector.extract_strided_slice %33 {offsets = [8, 0], sizes = [8, 64], strides = [1, 1]} : vector<16x384xf32> to vector<8x64xf32>
    %84 = vector.extract_strided_slice %33 {offsets = [8, 128], sizes = [8, 64], strides = [1, 1]} : vector<16x384xf32> to vector<8x64xf32>
    %85 = vector.extract_strided_slice %33 {offsets = [8, 256], sizes = [8, 64], strides = [1, 1]} : vector<16x384xf32> to vector<8x64xf32>
    %86 = arith.truncf %83 : vector<8x64xf32> to vector<8x64xbf16>
    %87 = arith.truncf %84 : vector<8x64xf32> to vector<8x64xbf16>
    %cst_28 = arith.constant dense<0.000000e+00> : vector<8x8xf32>
    %88 = tpu.matmul %86, %87, %cst_28 {dimension_numbers = #tpu.dot_dimension_numbers<[1], [1], [0], [0], [0, 0, 1, 0], [], []>} : vector<8x64xbf16>, vector<8x64xbf16>, vector<8x8xf32> -> vector<8x8xf32>
    %cst_29 = arith.constant 1.250000e-01 : f32
    %89 = vector.broadcast %cst_29 : f32 to vector<8x8xf32>
    %90 = arith.mulf %88, %89 : vector<8x8xf32>
    %91 = vector.broadcast %82 : vector<1x8xf32> to vector<8x8xf32>
    %92 = arith.addf %90, %91 : vector<8x8xf32>
    %cst_30 = arith.constant dense<0xFF800000> : vector<8xf32>
    %93 = vector.multi_reduction <maximumf>, %92, %cst_30 [1] : vector<8x8xf32> to vector<8xf32>
    %94 = vector.shape_cast %93 : vector<8xf32> to vector<8x1xf32>
    %95 = vector.broadcast %94 : vector<8x1xf32> to vector<8x8xf32>
    %96 = arith.subf %92, %95 : vector<8x8xf32>
    %97 = math.exp %96 : vector<8x8xf32>
    %cst_31 = arith.constant dense<0.000000e+00> : vector<8xf32>
    %98 = vector.multi_reduction <add>, %97, %cst_31 [1] : vector<8x8xf32> to vector<8xf32>
    %99 = vector.shape_cast %98 : vector<8xf32> to vector<8x1xf32>
    %100 = tpu.reciprocal %99 {approx = true} : vector<8x1xf32> -> vector<8x1xf32>
    %101 = vector.broadcast %100 : vector<8x1xf32> to vector<8x8xf32>
    %102 = arith.mulf %97, %101 : vector<8x8xf32>
    %103 = arith.truncf %102 : vector<8x8xf32> to vector<8x8xbf16>
    %104 = arith.truncf %85 : vector<8x64xf32> to vector<8x64xbf16>
    %cst_32 = arith.constant dense<0.000000e+00> : vector<8x64xf32>
    %105 = tpu.matmul %103, %104, %cst_32 {dimension_numbers = #tpu.dot_dimension_numbers<[1], [0], [0], [1], [0, 0, 1, 1], [], []>} : vector<8x8xbf16>, vector<8x64xbf16>, vector<8x64xf32> -> vector<8x64xf32>
    %106 = vector.extract_strided_slice %33 {offsets = [8, 64], sizes = [8, 64], strides = [1, 1]} : vector<16x384xf32> to vector<8x64xf32>
    %107 = vector.extract_strided_slice %33 {offsets = [8, 192], sizes = [8, 64], strides = [1, 1]} : vector<16x384xf32> to vector<8x64xf32>
    %108 = vector.extract_strided_slice %33 {offsets = [8, 320], sizes = [8, 64], strides = [1, 1]} : vector<16x384xf32> to vector<8x64xf32>
    %109 = arith.truncf %106 : vector<8x64xf32> to vector<8x64xbf16>
    %110 = arith.truncf %107 : vector<8x64xf32> to vector<8x64xbf16>
    %cst_33 = arith.constant dense<0.000000e+00> : vector<8x8xf32>
    %111 = tpu.matmul %109, %110, %cst_33 {dimension_numbers = #tpu.dot_dimension_numbers<[1], [1], [0], [0], [0, 0, 1, 0], [], []>} : vector<8x64xbf16>, vector<8x64xbf16>, vector<8x8xf32> -> vector<8x8xf32>
    %cst_34 = arith.constant 1.250000e-01 : f32
    %112 = vector.broadcast %cst_34 : f32 to vector<8x8xf32>
    %113 = arith.mulf %111, %112 : vector<8x8xf32>
    %114 = vector.broadcast %82 : vector<1x8xf32> to vector<8x8xf32>
    %115 = arith.addf %113, %114 : vector<8x8xf32>
    %cst_35 = arith.constant dense<0xFF800000> : vector<8xf32>
    %116 = vector.multi_reduction <maximumf>, %115, %cst_35 [1] : vector<8x8xf32> to vector<8xf32>
    %117 = vector.shape_cast %116 : vector<8xf32> to vector<8x1xf32>
    %118 = vector.broadcast %117 : vector<8x1xf32> to vector<8x8xf32>
    %119 = arith.subf %115, %118 : vector<8x8xf32>
    %120 = math.exp %119 : vector<8x8xf32>
    %cst_36 = arith.constant dense<0.000000e+00> : vector<8xf32>
    %121 = vector.multi_reduction <add>, %120, %cst_36 [1] : vector<8x8xf32> to vector<8xf32>
    %122 = vector.shape_cast %121 : vector<8xf32> to vector<8x1xf32>
    %123 = tpu.reciprocal %122 {approx = true} : vector<8x1xf32> -> vector<8x1xf32>
    %124 = vector.broadcast %123 : vector<8x1xf32> to vector<8x8xf32>
    %125 = arith.mulf %120, %124 : vector<8x8xf32>
    %126 = arith.truncf %125 : vector<8x8xf32> to vector<8x8xbf16>
    %127 = arith.truncf %108 : vector<8x64xf32> to vector<8x64xbf16>
    %cst_37 = arith.constant dense<0.000000e+00> : vector<8x64xf32>
    %128 = tpu.matmul %126, %127, %cst_37 {dimension_numbers = #tpu.dot_dimension_numbers<[1], [0], [0], [1], [0, 0, 1, 1], [], []>} : vector<8x8xbf16>, vector<8x64xbf16>, vector<8x64xf32> -> vector<8x64xf32>
    %129 = tpu.concatenate %105, %128 in 1 : vector<8x64xf32>, vector<8x64xf32> -> vector<8x128xf32>
    %130 = tpu.concatenate %81, %129 in 0 : vector<8x128xf32>, vector<8x128xf32> -> vector<16x128xf32>
    %c0_38 = arith.constant 0 : index
    %c0_39 = arith.constant 0 : index
    %c0_40 = arith.constant 0 : index
    %131 = vector.load %arg6[%c0_38, %c0_39, %c0_40] : memref<2x128x128xbf16, #tpu.memory_space<vmem>>, vector<1x128x128xbf16>
    %132 = vector.shape_cast %131 : vector<1x128x128xbf16> to vector<128x128xbf16>
    %133 = arith.truncf %130 : vector<16x128xf32> to vector<16x128xbf16>
    %cst_41 = arith.constant dense<0.000000e+00> : vector<16x128xf32>
    %134 = tpu.matmul %133, %132, %cst_41 {dimension_numbers = #tpu.dot_dimension_numbers<[1], [0], [0], [1], [0, 0, 1, 1], [], []>} : vector<16x128xbf16>, vector<128x128xbf16>, vector<16x128xf32> -> vector<16x128xf32>
    %c0_42 = arith.constant 0 : index
    %c0_43 = arith.constant 0 : index
    %c0_44 = arith.constant 0 : index
    %135 = vector.load %arg7[%c0_42, %c0_43, %c0_44] : memref<2x1x128xf32, #tpu.memory_space<vmem>>, vector<1x1x128xf32>
    %136 = vector.shape_cast %135 : vector<1x1x128xf32> to vector<1x128xf32>
    %137 = vector.broadcast %136 : vector<1x128xf32> to vector<16x128xf32>
    %138 = arith.addf %134, %137 : vector<16x128xf32>
    %139 = arith.addf %138, %25 : vector<16x128xf32>
    %c0_45 = arith.constant 0 : index
    %c0_46 = arith.constant 0 : index
    %c0_47 = arith.constant 0 : index
    %140 = vector.load %arg8[%c0_45, %c0_46, %c0_47] : memref<2x1x128xf32, #tpu.memory_space<vmem>>, vector<1x1x128xf32>
    %141 = vector.shape_cast %140 : vector<1x1x128xf32> to vector<1x128xf32>
    %c0_48 = arith.constant 0 : index
    %c0_49 = arith.constant 0 : index
    %c0_50 = arith.constant 0 : index
    %142 = vector.load %arg9[%c0_48, %c0_49, %c0_50] : memref<2x1x128xf32, #tpu.memory_space<vmem>>, vector<1x1x128xf32>
    %143 = vector.shape_cast %142 : vector<1x1x128xf32> to vector<1x128xf32>
    %cst_51 = arith.constant dense<0.000000e+00> : vector<16xf32>
    %144 = vector.multi_reduction <add>, %139, %cst_51 [1] : vector<16x128xf32> to vector<16xf32>
    %145 = vector.shape_cast %144 : vector<16xf32> to vector<16x1xf32>
    %cst_52 = arith.constant 1.280000e+02 : f32
    %146 = vector.broadcast %cst_52 : f32 to vector<16x1xf32>
    %147 = arith.divf %145, %146 : vector<16x1xf32>
    %148 = vector.broadcast %147 : vector<16x1xf32> to vector<16x128xf32>
    %149 = arith.subf %139, %148 : vector<16x128xf32>
    %150 = arith.mulf %149, %149 : vector<16x128xf32>
    %cst_53 = arith.constant dense<0.000000e+00> : vector<16xf32>
    %151 = vector.multi_reduction <add>, %150, %cst_53 [1] : vector<16x128xf32> to vector<16xf32>
    %152 = vector.shape_cast %151 : vector<16xf32> to vector<16x1xf32>
    %cst_54 = arith.constant 1.280000e+02 : f32
    %153 = vector.broadcast %cst_54 : f32 to vector<16x1xf32>
    %154 = arith.divf %152, %153 : vector<16x1xf32>
    %155 = vector.broadcast %147 : vector<16x1xf32> to vector<16x128xf32>
    %156 = arith.subf %139, %155 : vector<16x128xf32>
    %cst_55 = arith.constant 9.99999974E-6 : f32
    %157 = vector.broadcast %cst_55 : f32 to vector<16x1xf32>
    %158 = arith.addf %154, %157 : vector<16x1xf32>
    %159 = math.rsqrt %158 : vector<16x1xf32>
    %160 = vector.broadcast %159 : vector<16x1xf32> to vector<16x128xf32>
    %161 = arith.mulf %156, %160 : vector<16x128xf32>
    %162 = vector.broadcast %141 : vector<1x128xf32> to vector<16x128xf32>
    %163 = arith.mulf %161, %162 : vector<16x128xf32>
    %164 = vector.broadcast %143 : vector<1x128xf32> to vector<16x128xf32>
    %165 = arith.addf %163, %164 : vector<16x128xf32>
    %c0_56 = arith.constant 0 : index
    %c0_57 = arith.constant 0 : index
    %c0_58 = arith.constant 0 : index
    %166 = vector.load %arg10[%c0_56, %c0_57, %c0_58] : memref<2x128x256xbf16, #tpu.memory_space<vmem>>, vector<1x128x256xbf16>
    %167 = vector.shape_cast %166 : vector<1x128x256xbf16> to vector<128x256xbf16>
    %168 = arith.truncf %165 : vector<16x128xf32> to vector<16x128xbf16>
    %cst_59 = arith.constant dense<0.000000e+00> : vector<16x256xf32>
    %169 = tpu.matmul %168, %167, %cst_59 {dimension_numbers = #tpu.dot_dimension_numbers<[1], [0], [0], [1], [0, 0, 1, 1], [], []>} : vector<16x128xbf16>, vector<128x256xbf16>, vector<16x256xf32> -> vector<16x256xf32>
    %c0_60 = arith.constant 0 : index
    %c0_61 = arith.constant 0 : index
    %c0_62 = arith.constant 0 : index
    %170 = vector.load %arg11[%c0_60, %c0_61, %c0_62] : memref<2x1x256xf32, #tpu.memory_space<vmem>>, vector<1x1x256xf32>
    %171 = vector.shape_cast %170 : vector<1x1x256xf32> to vector<1x256xf32>
    %172 = vector.broadcast %171 : vector<1x256xf32> to vector<16x256xf32>
    %173 = arith.addf %169, %172 : vector<16x256xf32>
    %174 = arith.mulf %173, %173 : vector<16x256xf32>
    %175 = arith.mulf %173, %174 : vector<16x256xf32>
    %cst_63 = arith.constant 4.471500e-02 : f32
    %176 = vector.broadcast %cst_63 : f32 to vector<16x256xf32>
    %177 = arith.mulf %176, %175 : vector<16x256xf32>
    %178 = arith.addf %173, %177 : vector<16x256xf32>
    %cst_64 = arith.constant 0.797884583 : f32
    %179 = vector.broadcast %cst_64 : f32 to vector<16x256xf32>
    %180 = arith.mulf %179, %178 : vector<16x256xf32>
    %181 = math.tanh %180 : vector<16x256xf32>
    %cst_65 = arith.constant 1.000000e+00 : f32
    %182 = vector.broadcast %cst_65 : f32 to vector<16x256xf32>
    %183 = arith.addf %182, %181 : vector<16x256xf32>
    %cst_66 = arith.constant 5.000000e-01 : f32
    %184 = vector.broadcast %cst_66 : f32 to vector<16x256xf32>
    %185 = arith.mulf %184, %183 : vector<16x256xf32>
    %186 = arith.mulf %173, %185 : vector<16x256xf32>
    %c0_67 = arith.constant 0 : index
    %c0_68 = arith.constant 0 : index
    %c0_69 = arith.constant 0 : index
    %187 = vector.load %arg12[%c0_67, %c0_68, %c0_69] : memref<2x256x128xbf16, #tpu.memory_space<vmem>>, vector<1x256x128xbf16>
    %188 = vector.shape_cast %187 : vector<1x256x128xbf16> to vector<256x128xbf16>
    %189 = arith.truncf %186 : vector<16x256xf32> to vector<16x256xbf16>
    %cst_70 = arith.constant dense<0.000000e+00> : vector<16x128xf32>
    %190 = tpu.matmul %189, %188, %cst_70 {dimension_numbers = #tpu.dot_dimension_numbers<[1], [0], [0], [1], [0, 0, 1, 1], [], []>} : vector<16x256xbf16>, vector<256x128xbf16>, vector<16x128xf32> -> vector<16x128xf32>
    %c0_71 = arith.constant 0 : index
    %c0_72 = arith.constant 0 : index
    %c0_73 = arith.constant 0 : index
    %191 = vector.load %arg13[%c0_71, %c0_72, %c0_73] : memref<2x1x128xf32, #tpu.memory_space<vmem>>, vector<1x1x128xf32>
    %192 = vector.shape_cast %191 : vector<1x1x128xf32> to vector<1x128xf32>
    %193 = vector.broadcast %192 : vector<1x128xf32> to vector<16x128xf32>
    %194 = arith.addf %190, %193 : vector<16x128xf32>
    %195 = arith.addf %194, %165 : vector<16x128xf32>
    %c0_74 = arith.constant 0 : index
    %c0_75 = arith.constant 0 : index
    %c0_76 = arith.constant 0 : index
    %196 = vector.load %arg14[%c0_74, %c0_75, %c0_76] : memref<2x1x128xf32, #tpu.memory_space<vmem>>, vector<1x1x128xf32>
    %197 = vector.shape_cast %196 : vector<1x1x128xf32> to vector<1x128xf32>
    %c0_77 = arith.constant 0 : index
    %c0_78 = arith.constant 0 : index
    %c0_79 = arith.constant 0 : index
    %198 = vector.load %arg15[%c0_77, %c0_78, %c0_79] : memref<2x1x128xf32, #tpu.memory_space<vmem>>, vector<1x1x128xf32>
    %199 = vector.shape_cast %198 : vector<1x1x128xf32> to vector<1x128xf32>
    %cst_80 = arith.constant dense<0.000000e+00> : vector<16xf32>
    %200 = vector.multi_reduction <add>, %195, %cst_80 [1] : vector<16x128xf32> to vector<16xf32>
    %201 = vector.shape_cast %200 : vector<16xf32> to vector<16x1xf32>
    %cst_81 = arith.constant 1.280000e+02 : f32
    %202 = vector.broadcast %cst_81 : f32 to vector<16x1xf32>
    %203 = arith.divf %201, %202 : vector<16x1xf32>
    %204 = vector.broadcast %203 : vector<16x1xf32> to vector<16x128xf32>
    %205 = arith.subf %195, %204 : vector<16x128xf32>
    %206 = arith.mulf %205, %205 : vector<16x128xf32>
    %cst_82 = arith.constant dense<0.000000e+00> : vector<16xf32>
    %207 = vector.multi_reduction <add>, %206, %cst_82 [1] : vector<16x128xf32> to vector<16xf32>
    %208 = vector.shape_cast %207 : vector<16xf32> to vector<16x1xf32>
    %cst_83 = arith.constant 1.280000e+02 : f32
    %209 = vector.broadcast %cst_83 : f32 to vector<16x1xf32>
    %210 = arith.divf %208, %209 : vector<16x1xf32>
    %211 = vector.broadcast %203 : vector<16x1xf32> to vector<16x128xf32>
    %212 = arith.subf %195, %211 : vector<16x128xf32>
    %cst_84 = arith.constant 9.99999974E-6 : f32
    %213 = vector.broadcast %cst_84 : f32 to vector<16x1xf32>
    %214 = arith.addf %210, %213 : vector<16x1xf32>
    %215 = math.rsqrt %214 : vector<16x1xf32>
    %216 = vector.broadcast %215 : vector<16x1xf32> to vector<16x128xf32>
    %217 = arith.mulf %212, %216 : vector<16x128xf32>
    %218 = vector.broadcast %197 : vector<1x128xf32> to vector<16x128xf32>
    %219 = arith.mulf %217, %218 : vector<16x128xf32>
    %220 = vector.broadcast %199 : vector<1x128xf32> to vector<16x128xf32>
    %221 = arith.addf %219, %220 : vector<16x128xf32>
    %c1 = arith.constant 1 : index
    %c0_85 = arith.constant 0 : index
    %c0_86 = arith.constant 0 : index
    %222 = vector.load %arg4[%c1, %c0_85, %c0_86] : memref<2x128x384xbf16, #tpu.memory_space<vmem>>, vector<1x128x384xbf16>
    %223 = vector.shape_cast %222 : vector<1x128x384xbf16> to vector<128x384xbf16>
    %224 = arith.truncf %221 : vector<16x128xf32> to vector<16x128xbf16>
    %cst_87 = arith.constant dense<0.000000e+00> : vector<16x384xf32>
    %225 = tpu.matmul %224, %223, %cst_87 {dimension_numbers = #tpu.dot_dimension_numbers<[1], [0], [0], [1], [0, 0, 1, 1], [], []>} : vector<16x128xbf16>, vector<128x384xbf16>, vector<16x384xf32> -> vector<16x384xf32>
    %c1_88 = arith.constant 1 : index
    %c0_89 = arith.constant 0 : index
    %c0_90 = arith.constant 0 : index
    %226 = vector.load %arg5[%c1_88, %c0_89, %c0_90] : memref<2x1x384xf32, #tpu.memory_space<vmem>>, vector<1x1x384xf32>
    %227 = vector.shape_cast %226 : vector<1x1x384xf32> to vector<1x384xf32>
    %228 = vector.broadcast %227 : vector<1x384xf32> to vector<16x384xf32>
    %229 = arith.addf %225, %228 : vector<16x384xf32>
    %230 = vector.extract_strided_slice %0 {offsets = [0, 0], sizes = [1, 8], strides = [1, 1]} : vector<2x8xf32> to vector<1x8xf32>
    %231 = vector.extract_strided_slice %229 {offsets = [0, 0], sizes = [8, 64], strides = [1, 1]} : vector<16x384xf32> to vector<8x64xf32>
    %232 = vector.extract_strided_slice %229 {offsets = [0, 128], sizes = [8, 64], strides = [1, 1]} : vector<16x384xf32> to vector<8x64xf32>
    %233 = vector.extract_strided_slice %229 {offsets = [0, 256], sizes = [8, 64], strides = [1, 1]} : vector<16x384xf32> to vector<8x64xf32>
    %234 = arith.truncf %231 : vector<8x64xf32> to vector<8x64xbf16>
    %235 = arith.truncf %232 : vector<8x64xf32> to vector<8x64xbf16>
    %cst_91 = arith.constant dense<0.000000e+00> : vector<8x8xf32>
    %236 = tpu.matmul %234, %235, %cst_91 {dimension_numbers = #tpu.dot_dimension_numbers<[1], [1], [0], [0], [0, 0, 1, 0], [], []>} : vector<8x64xbf16>, vector<8x64xbf16>, vector<8x8xf32> -> vector<8x8xf32>
    %cst_92 = arith.constant 1.250000e-01 : f32
    %237 = vector.broadcast %cst_92 : f32 to vector<8x8xf32>
    %238 = arith.mulf %236, %237 : vector<8x8xf32>
    %239 = vector.broadcast %230 : vector<1x8xf32> to vector<8x8xf32>
    %240 = arith.addf %238, %239 : vector<8x8xf32>
    %cst_93 = arith.constant dense<0xFF800000> : vector<8xf32>
    %241 = vector.multi_reduction <maximumf>, %240, %cst_93 [1] : vector<8x8xf32> to vector<8xf32>
    %242 = vector.shape_cast %241 : vector<8xf32> to vector<8x1xf32>
    %243 = vector.broadcast %242 : vector<8x1xf32> to vector<8x8xf32>
    %244 = arith.subf %240, %243 : vector<8x8xf32>
    %245 = math.exp %244 : vector<8x8xf32>
    %cst_94 = arith.constant dense<0.000000e+00> : vector<8xf32>
    %246 = vector.multi_reduction <add>, %245, %cst_94 [1] : vector<8x8xf32> to vector<8xf32>
    %247 = vector.shape_cast %246 : vector<8xf32> to vector<8x1xf32>
    %248 = tpu.reciprocal %247 {approx = true} : vector<8x1xf32> -> vector<8x1xf32>
    %249 = vector.broadcast %248 : vector<8x1xf32> to vector<8x8xf32>
    %250 = arith.mulf %245, %249 : vector<8x8xf32>
    %251 = arith.truncf %250 : vector<8x8xf32> to vector<8x8xbf16>
    %252 = arith.truncf %233 : vector<8x64xf32> to vector<8x64xbf16>
    %cst_95 = arith.constant dense<0.000000e+00> : vector<8x64xf32>
    %253 = tpu.matmul %251, %252, %cst_95 {dimension_numbers = #tpu.dot_dimension_numbers<[1], [0], [0], [1], [0, 0, 1, 1], [], []>} : vector<8x8xbf16>, vector<8x64xbf16>, vector<8x64xf32> -> vector<8x64xf32>
    %254 = vector.extract_strided_slice %229 {offsets = [0, 64], sizes = [8, 64], strides = [1, 1]} : vector<16x384xf32> to vector<8x64xf32>
    %255 = vector.extract_strided_slice %229 {offsets = [0, 192], sizes = [8, 64], strides = [1, 1]} : vector<16x384xf32> to vector<8x64xf32>
    %256 = vector.extract_strided_slice %229 {offsets = [0, 320], sizes = [8, 64], strides = [1, 1]} : vector<16x384xf32> to vector<8x64xf32>
    %257 = arith.truncf %254 : vector<8x64xf32> to vector<8x64xbf16>
    %258 = arith.truncf %255 : vector<8x64xf32> to vector<8x64xbf16>
    %cst_96 = arith.constant dense<0.000000e+00> : vector<8x8xf32>
    %259 = tpu.matmul %257, %258, %cst_96 {dimension_numbers = #tpu.dot_dimension_numbers<[1], [1], [0], [0], [0, 0, 1, 0], [], []>} : vector<8x64xbf16>, vector<8x64xbf16>, vector<8x8xf32> -> vector<8x8xf32>
    %cst_97 = arith.constant 1.250000e-01 : f32
    %260 = vector.broadcast %cst_97 : f32 to vector<8x8xf32>
    %261 = arith.mulf %259, %260 : vector<8x8xf32>
    %262 = vector.broadcast %230 : vector<1x8xf32> to vector<8x8xf32>
    %263 = arith.addf %261, %262 : vector<8x8xf32>
    %cst_98 = arith.constant dense<0xFF800000> : vector<8xf32>
    %264 = vector.multi_reduction <maximumf>, %263, %cst_98 [1] : vector<8x8xf32> to vector<8xf32>
    %265 = vector.shape_cast %264 : vector<8xf32> to vector<8x1xf32>
    %266 = vector.broadcast %265 : vector<8x1xf32> to vector<8x8xf32>
    %267 = arith.subf %263, %266 : vector<8x8xf32>
    %268 = math.exp %267 : vector<8x8xf32>
    %cst_99 = arith.constant dense<0.000000e+00> : vector<8xf32>
    %269 = vector.multi_reduction <add>, %268, %cst_99 [1] : vector<8x8xf32> to vector<8xf32>
    %270 = vector.shape_cast %269 : vector<8xf32> to vector<8x1xf32>
    %271 = tpu.reciprocal %270 {approx = true} : vector<8x1xf32> -> vector<8x1xf32>
    %272 = vector.broadcast %271 : vector<8x1xf32> to vector<8x8xf32>
    %273 = arith.mulf %268, %272 : vector<8x8xf32>
    %274 = arith.truncf %273 : vector<8x8xf32> to vector<8x8xbf16>
    %275 = arith.truncf %256 : vector<8x64xf32> to vector<8x64xbf16>
    %cst_100 = arith.constant dense<0.000000e+00> : vector<8x64xf32>
    %276 = tpu.matmul %274, %275, %cst_100 {dimension_numbers = #tpu.dot_dimension_numbers<[1], [0], [0], [1], [0, 0, 1, 1], [], []>} : vector<8x8xbf16>, vector<8x64xbf16>, vector<8x64xf32> -> vector<8x64xf32>
    %277 = tpu.concatenate %253, %276 in 1 : vector<8x64xf32>, vector<8x64xf32> -> vector<8x128xf32>
    %278 = vector.extract_strided_slice %0 {offsets = [1, 0], sizes = [1, 8], strides = [1, 1]} : vector<2x8xf32> to vector<1x8xf32>
    %279 = vector.extract_strided_slice %229 {offsets = [8, 0], sizes = [8, 64], strides = [1, 1]} : vector<16x384xf32> to vector<8x64xf32>
    %280 = vector.extract_strided_slice %229 {offsets = [8, 128], sizes = [8, 64], strides = [1, 1]} : vector<16x384xf32> to vector<8x64xf32>
    %281 = vector.extract_strided_slice %229 {offsets = [8, 256], sizes = [8, 64], strides = [1, 1]} : vector<16x384xf32> to vector<8x64xf32>
    %282 = arith.truncf %279 : vector<8x64xf32> to vector<8x64xbf16>
    %283 = arith.truncf %280 : vector<8x64xf32> to vector<8x64xbf16>
    %cst_101 = arith.constant dense<0.000000e+00> : vector<8x8xf32>
    %284 = tpu.matmul %282, %283, %cst_101 {dimension_numbers = #tpu.dot_dimension_numbers<[1], [1], [0], [0], [0, 0, 1, 0], [], []>} : vector<8x64xbf16>, vector<8x64xbf16>, vector<8x8xf32> -> vector<8x8xf32>
    %cst_102 = arith.constant 1.250000e-01 : f32
    %285 = vector.broadcast %cst_102 : f32 to vector<8x8xf32>
    %286 = arith.mulf %284, %285 : vector<8x8xf32>
    %287 = vector.broadcast %278 : vector<1x8xf32> to vector<8x8xf32>
    %288 = arith.addf %286, %287 : vector<8x8xf32>
    %cst_103 = arith.constant dense<0xFF800000> : vector<8xf32>
    %289 = vector.multi_reduction <maximumf>, %288, %cst_103 [1] : vector<8x8xf32> to vector<8xf32>
    %290 = vector.shape_cast %289 : vector<8xf32> to vector<8x1xf32>
    %291 = vector.broadcast %290 : vector<8x1xf32> to vector<8x8xf32>
    %292 = arith.subf %288, %291 : vector<8x8xf32>
    %293 = math.exp %292 : vector<8x8xf32>
    %cst_104 = arith.constant dense<0.000000e+00> : vector<8xf32>
    %294 = vector.multi_reduction <add>, %293, %cst_104 [1] : vector<8x8xf32> to vector<8xf32>
    %295 = vector.shape_cast %294 : vector<8xf32> to vector<8x1xf32>
    %296 = tpu.reciprocal %295 {approx = true} : vector<8x1xf32> -> vector<8x1xf32>
    %297 = vector.broadcast %296 : vector<8x1xf32> to vector<8x8xf32>
    %298 = arith.mulf %293, %297 : vector<8x8xf32>
    %299 = arith.truncf %298 : vector<8x8xf32> to vector<8x8xbf16>
    %300 = arith.truncf %281 : vector<8x64xf32> to vector<8x64xbf16>
    %cst_105 = arith.constant dense<0.000000e+00> : vector<8x64xf32>
    %301 = tpu.matmul %299, %300, %cst_105 {dimension_numbers = #tpu.dot_dimension_numbers<[1], [0], [0], [1], [0, 0, 1, 1], [], []>} : vector<8x8xbf16>, vector<8x64xbf16>, vector<8x64xf32> -> vector<8x64xf32>
    %302 = vector.extract_strided_slice %229 {offsets = [8, 64], sizes = [8, 64], strides = [1, 1]} : vector<16x384xf32> to vector<8x64xf32>
    %303 = vector.extract_strided_slice %229 {offsets = [8, 192], sizes = [8, 64], strides = [1, 1]} : vector<16x384xf32> to vector<8x64xf32>
    %304 = vector.extract_strided_slice %229 {offsets = [8, 320], sizes = [8, 64], strides = [1, 1]} : vector<16x384xf32> to vector<8x64xf32>
    %305 = arith.truncf %302 : vector<8x64xf32> to vector<8x64xbf16>
    %306 = arith.truncf %303 : vector<8x64xf32> to vector<8x64xbf16>
    %cst_106 = arith.constant dense<0.000000e+00> : vector<8x8xf32>
    %307 = tpu.matmul %305, %306, %cst_106 {dimension_numbers = #tpu.dot_dimension_numbers<[1], [1], [0], [0], [0, 0, 1, 0], [], []>} : vector<8x64xbf16>, vector<8x64xbf16>, vector<8x8xf32> -> vector<8x8xf32>
    %cst_107 = arith.constant 1.250000e-01 : f32
    %308 = vector.broadcast %cst_107 : f32 to vector<8x8xf32>
    %309 = arith.mulf %307, %308 : vector<8x8xf32>
    %310 = vector.broadcast %278 : vector<1x8xf32> to vector<8x8xf32>
    %311 = arith.addf %309, %310 : vector<8x8xf32>
    %cst_108 = arith.constant dense<0xFF800000> : vector<8xf32>
    %312 = vector.multi_reduction <maximumf>, %311, %cst_108 [1] : vector<8x8xf32> to vector<8xf32>
    %313 = vector.shape_cast %312 : vector<8xf32> to vector<8x1xf32>
    %314 = vector.broadcast %313 : vector<8x1xf32> to vector<8x8xf32>
    %315 = arith.subf %311, %314 : vector<8x8xf32>
    %316 = math.exp %315 : vector<8x8xf32>
    %cst_109 = arith.constant dense<0.000000e+00> : vector<8xf32>
    %317 = vector.multi_reduction <add>, %316, %cst_109 [1] : vector<8x8xf32> to vector<8xf32>
    %318 = vector.shape_cast %317 : vector<8xf32> to vector<8x1xf32>
    %319 = tpu.reciprocal %318 {approx = true} : vector<8x1xf32> -> vector<8x1xf32>
    %320 = vector.broadcast %319 : vector<8x1xf32> to vector<8x8xf32>
    %321 = arith.mulf %316, %320 : vector<8x8xf32>
    %322 = arith.truncf %321 : vector<8x8xf32> to vector<8x8xbf16>
    %323 = arith.truncf %304 : vector<8x64xf32> to vector<8x64xbf16>
    %cst_110 = arith.constant dense<0.000000e+00> : vector<8x64xf32>
    %324 = tpu.matmul %322, %323, %cst_110 {dimension_numbers = #tpu.dot_dimension_numbers<[1], [0], [0], [1], [0, 0, 1, 1], [], []>} : vector<8x8xbf16>, vector<8x64xbf16>, vector<8x64xf32> -> vector<8x64xf32>
    %325 = tpu.concatenate %301, %324 in 1 : vector<8x64xf32>, vector<8x64xf32> -> vector<8x128xf32>
    %326 = tpu.concatenate %277, %325 in 0 : vector<8x128xf32>, vector<8x128xf32> -> vector<16x128xf32>
    %c1_111 = arith.constant 1 : index
    %c0_112 = arith.constant 0 : index
    %c0_113 = arith.constant 0 : index
    %327 = vector.load %arg6[%c1_111, %c0_112, %c0_113] : memref<2x128x128xbf16, #tpu.memory_space<vmem>>, vector<1x128x128xbf16>
    %328 = vector.shape_cast %327 : vector<1x128x128xbf16> to vector<128x128xbf16>
    %329 = arith.truncf %326 : vector<16x128xf32> to vector<16x128xbf16>
    %cst_114 = arith.constant dense<0.000000e+00> : vector<16x128xf32>
    %330 = tpu.matmul %329, %328, %cst_114 {dimension_numbers = #tpu.dot_dimension_numbers<[1], [0], [0], [1], [0, 0, 1, 1], [], []>} : vector<16x128xbf16>, vector<128x128xbf16>, vector<16x128xf32> -> vector<16x128xf32>
    %c1_115 = arith.constant 1 : index
    %c0_116 = arith.constant 0 : index
    %c0_117 = arith.constant 0 : index
    %331 = vector.load %arg7[%c1_115, %c0_116, %c0_117] : memref<2x1x128xf32, #tpu.memory_space<vmem>>, vector<1x1x128xf32>
    %332 = vector.shape_cast %331 : vector<1x1x128xf32> to vector<1x128xf32>
    %333 = vector.broadcast %332 : vector<1x128xf32> to vector<16x128xf32>
    %334 = arith.addf %330, %333 : vector<16x128xf32>
    %335 = arith.addf %334, %221 : vector<16x128xf32>
    %c1_118 = arith.constant 1 : index
    %c0_119 = arith.constant 0 : index
    %c0_120 = arith.constant 0 : index
    %336 = vector.load %arg8[%c1_118, %c0_119, %c0_120] : memref<2x1x128xf32, #tpu.memory_space<vmem>>, vector<1x1x128xf32>
    %337 = vector.shape_cast %336 : vector<1x1x128xf32> to vector<1x128xf32>
    %c1_121 = arith.constant 1 : index
    %c0_122 = arith.constant 0 : index
    %c0_123 = arith.constant 0 : index
    %338 = vector.load %arg9[%c1_121, %c0_122, %c0_123] : memref<2x1x128xf32, #tpu.memory_space<vmem>>, vector<1x1x128xf32>
    %339 = vector.shape_cast %338 : vector<1x1x128xf32> to vector<1x128xf32>
    %cst_124 = arith.constant dense<0.000000e+00> : vector<16xf32>
    %340 = vector.multi_reduction <add>, %335, %cst_124 [1] : vector<16x128xf32> to vector<16xf32>
    %341 = vector.shape_cast %340 : vector<16xf32> to vector<16x1xf32>
    %cst_125 = arith.constant 1.280000e+02 : f32
    %342 = vector.broadcast %cst_125 : f32 to vector<16x1xf32>
    %343 = arith.divf %341, %342 : vector<16x1xf32>
    %344 = vector.broadcast %343 : vector<16x1xf32> to vector<16x128xf32>
    %345 = arith.subf %335, %344 : vector<16x128xf32>
    %346 = arith.mulf %345, %345 : vector<16x128xf32>
    %cst_126 = arith.constant dense<0.000000e+00> : vector<16xf32>
    %347 = vector.multi_reduction <add>, %346, %cst_126 [1] : vector<16x128xf32> to vector<16xf32>
    %348 = vector.shape_cast %347 : vector<16xf32> to vector<16x1xf32>
    %cst_127 = arith.constant 1.280000e+02 : f32
    %349 = vector.broadcast %cst_127 : f32 to vector<16x1xf32>
    %350 = arith.divf %348, %349 : vector<16x1xf32>
    %351 = vector.broadcast %343 : vector<16x1xf32> to vector<16x128xf32>
    %352 = arith.subf %335, %351 : vector<16x128xf32>
    %cst_128 = arith.constant 9.99999974E-6 : f32
    %353 = vector.broadcast %cst_128 : f32 to vector<16x1xf32>
    %354 = arith.addf %350, %353 : vector<16x1xf32>
    %355 = math.rsqrt %354 : vector<16x1xf32>
    %356 = vector.broadcast %355 : vector<16x1xf32> to vector<16x128xf32>
    %357 = arith.mulf %352, %356 : vector<16x128xf32>
    %358 = vector.broadcast %337 : vector<1x128xf32> to vector<16x128xf32>
    %359 = arith.mulf %357, %358 : vector<16x128xf32>
    %360 = vector.broadcast %339 : vector<1x128xf32> to vector<16x128xf32>
    %361 = arith.addf %359, %360 : vector<16x128xf32>
    %c1_129 = arith.constant 1 : index
    %c0_130 = arith.constant 0 : index
    %c0_131 = arith.constant 0 : index
    %362 = vector.load %arg10[%c1_129, %c0_130, %c0_131] : memref<2x128x256xbf16, #tpu.memory_space<vmem>>, vector<1x128x256xbf16>
    %363 = vector.shape_cast %362 : vector<1x128x256xbf16> to vector<128x256xbf16>
    %364 = arith.truncf %361 : vector<16x128xf32> to vector<16x128xbf16>
    %cst_132 = arith.constant dense<0.000000e+00> : vector<16x256xf32>
    %365 = tpu.matmul %364, %363, %cst_132 {dimension_numbers = #tpu.dot_dimension_numbers<[1], [0], [0], [1], [0, 0, 1, 1], [], []>} : vector<16x128xbf16>, vector<128x256xbf16>, vector<16x256xf32> -> vector<16x256xf32>
    %c1_133 = arith.constant 1 : index
    %c0_134 = arith.constant 0 : index
    %c0_135 = arith.constant 0 : index
    %366 = vector.load %arg11[%c1_133, %c0_134, %c0_135] : memref<2x1x256xf32, #tpu.memory_space<vmem>>, vector<1x1x256xf32>
    %367 = vector.shape_cast %366 : vector<1x1x256xf32> to vector<1x256xf32>
    %368 = vector.broadcast %367 : vector<1x256xf32> to vector<16x256xf32>
    %369 = arith.addf %365, %368 : vector<16x256xf32>
    %370 = arith.mulf %369, %369 : vector<16x256xf32>
    %371 = arith.mulf %369, %370 : vector<16x256xf32>
    %cst_136 = arith.constant 4.471500e-02 : f32
    %372 = vector.broadcast %cst_136 : f32 to vector<16x256xf32>
    %373 = arith.mulf %372, %371 : vector<16x256xf32>
    %374 = arith.addf %369, %373 : vector<16x256xf32>
    %cst_137 = arith.constant 0.797884583 : f32
    %375 = vector.broadcast %cst_137 : f32 to vector<16x256xf32>
    %376 = arith.mulf %375, %374 : vector<16x256xf32>
    %377 = math.tanh %376 : vector<16x256xf32>
    %cst_138 = arith.constant 1.000000e+00 : f32
    %378 = vector.broadcast %cst_138 : f32 to vector<16x256xf32>
    %379 = arith.addf %378, %377 : vector<16x256xf32>
    %cst_139 = arith.constant 5.000000e-01 : f32
    %380 = vector.broadcast %cst_139 : f32 to vector<16x256xf32>
    %381 = arith.mulf %380, %379 : vector<16x256xf32>
    %382 = arith.mulf %369, %381 : vector<16x256xf32>
    %c1_140 = arith.constant 1 : index
    %c0_141 = arith.constant 0 : index
    %c0_142 = arith.constant 0 : index
    %383 = vector.load %arg12[%c1_140, %c0_141, %c0_142] : memref<2x256x128xbf16, #tpu.memory_space<vmem>>, vector<1x256x128xbf16>
    %384 = vector.shape_cast %383 : vector<1x256x128xbf16> to vector<256x128xbf16>
    %385 = arith.truncf %382 : vector<16x256xf32> to vector<16x256xbf16>
    %cst_143 = arith.constant dense<0.000000e+00> : vector<16x128xf32>
    %386 = tpu.matmul %385, %384, %cst_143 {dimension_numbers = #tpu.dot_dimension_numbers<[1], [0], [0], [1], [0, 0, 1, 1], [], []>} : vector<16x256xbf16>, vector<256x128xbf16>, vector<16x128xf32> -> vector<16x128xf32>
    %c1_144 = arith.constant 1 : index
    %c0_145 = arith.constant 0 : index
    %c0_146 = arith.constant 0 : index
    %387 = vector.load %arg13[%c1_144, %c0_145, %c0_146] : memref<2x1x128xf32, #tpu.memory_space<vmem>>, vector<1x1x128xf32>
    %388 = vector.shape_cast %387 : vector<1x1x128xf32> to vector<1x128xf32>
    %389 = vector.broadcast %388 : vector<1x128xf32> to vector<16x128xf32>
    %390 = arith.addf %386, %389 : vector<16x128xf32>
    %391 = arith.addf %390, %361 : vector<16x128xf32>
    %c1_147 = arith.constant 1 : index
    %c0_148 = arith.constant 0 : index
    %c0_149 = arith.constant 0 : index
    %392 = vector.load %arg14[%c1_147, %c0_148, %c0_149] : memref<2x1x128xf32, #tpu.memory_space<vmem>>, vector<1x1x128xf32>
    %393 = vector.shape_cast %392 : vector<1x1x128xf32> to vector<1x128xf32>
    %c1_150 = arith.constant 1 : index
    %c0_151 = arith.constant 0 : index
    %c0_152 = arith.constant 0 : index
    %394 = vector.load %arg15[%c1_150, %c0_151, %c0_152] : memref<2x1x128xf32, #tpu.memory_space<vmem>>, vector<1x1x128xf32>
    %395 = vector.shape_cast %394 : vector<1x1x128xf32> to vector<1x128xf32>
    %cst_153 = arith.constant dense<0.000000e+00> : vector<16xf32>
    %396 = vector.multi_reduction <add>, %391, %cst_153 [1] : vector<16x128xf32> to vector<16xf32>
    %397 = vector.shape_cast %396 : vector<16xf32> to vector<16x1xf32>
    %cst_154 = arith.constant 1.280000e+02 : f32
    %398 = vector.broadcast %cst_154 : f32 to vector<16x1xf32>
    %399 = arith.divf %397, %398 : vector<16x1xf32>
    %400 = vector.broadcast %399 : vector<16x1xf32> to vector<16x128xf32>
    %401 = arith.subf %391, %400 : vector<16x128xf32>
    %402 = arith.mulf %401, %401 : vector<16x128xf32>
    %cst_155 = arith.constant dense<0.000000e+00> : vector<16xf32>
    %403 = vector.multi_reduction <add>, %402, %cst_155 [1] : vector<16x128xf32> to vector<16xf32>
    %404 = vector.shape_cast %403 : vector<16xf32> to vector<16x1xf32>
    %cst_156 = arith.constant 1.280000e+02 : f32
    %405 = vector.broadcast %cst_156 : f32 to vector<16x1xf32>
    %406 = arith.divf %404, %405 : vector<16x1xf32>
    %407 = vector.broadcast %399 : vector<16x1xf32> to vector<16x128xf32>
    %408 = arith.subf %391, %407 : vector<16x128xf32>
    %cst_157 = arith.constant 9.99999974E-6 : f32
    %409 = vector.broadcast %cst_157 : f32 to vector<16x1xf32>
    %410 = arith.addf %406, %409 : vector<16x1xf32>
    %411 = math.rsqrt %410 : vector<16x1xf32>
    %412 = vector.broadcast %411 : vector<16x1xf32> to vector<16x128xf32>
    %413 = arith.mulf %408, %412 : vector<16x128xf32>
    %414 = vector.broadcast %393 : vector<1x128xf32> to vector<16x128xf32>
    %415 = arith.mulf %413, %414 : vector<16x128xf32>
    %416 = vector.broadcast %395 : vector<1x128xf32> to vector<16x128xf32>
    %417 = arith.addf %415, %416 : vector<16x128xf32>
    %418 = vector.extract_strided_slice %417 {offsets = [0, 0], sizes = [1, 128], strides = [1, 1]} : vector<16x128xf32> to vector<1x128xf32>
    %419 = vector.extract_strided_slice %417 {offsets = [8, 0], sizes = [1, 128], strides = [1, 1]} : vector<16x128xf32> to vector<1x128xf32>
    %420 = tpu.concatenate %418, %419 in 0 : vector<1x128xf32>, vector<1x128xf32> -> vector<2x128xf32>
    %c0_158 = arith.constant 0 : index
    %c0_159 = arith.constant 0 : index
    %421 = vector.load %arg16[%c0_158, %c0_159] : memref<128x128xbf16, #tpu.memory_space<vmem>>, vector<128x128xbf16>
    %422 = arith.truncf %420 : vector<2x128xf32> to vector<2x128xbf16>
    %cst_160 = arith.constant dense<0.000000e+00> : vector<2x128xf32>
    %423 = tpu.matmul %422, %421, %cst_160 {dimension_numbers = #tpu.dot_dimension_numbers<[1], [0], [0], [1], [0, 0, 1, 1], [], []>} : vector<2x128xbf16>, vector<128x128xbf16>, vector<2x128xf32> -> vector<2x128xf32>
    %c0_161 = arith.constant 0 : index
    %c0_162 = arith.constant 0 : index
    %424 = vector.load %arg17[%c0_161, %c0_162] : memref<1x128xf32, #tpu.memory_space<vmem>>, vector<1x128xf32>
    %425 = vector.broadcast %424 : vector<1x128xf32> to vector<2x128xf32>
    %426 = arith.addf %423, %425 : vector<2x128xf32>
    %427 = math.tanh %426 : vector<2x128xf32>
    %c0_163 = arith.constant 0 : index
    %c0_164 = arith.constant 0 : index
    %428 = vector.load %arg18[%c0_163, %c0_164] : memref<128x5xbf16, #tpu.memory_space<vmem>>, vector<128x5xbf16>
    %429 = arith.truncf %427 : vector<2x128xf32> to vector<2x128xbf16>
    %cst_165 = arith.constant dense<0.000000e+00> : vector<2x5xf32>
    %430 = tpu.matmul %429, %428, %cst_165 {dimension_numbers = #tpu.dot_dimension_numbers<[1], [0], [0], [1], [0, 0, 1, 1], [], []>} : vector<2x128xbf16>, vector<128x5xbf16>, vector<2x5xf32> -> vector<2x5xf32>
    %c0_166 = arith.constant 0 : index
    %c0_167 = arith.constant 0 : index
    %431 = vector.load %arg19[%c0_166, %c0_167] : memref<1x5xf32, #tpu.memory_space<vmem>>, vector<1x5xf32>
    %432 = vector.broadcast %431 : vector<1x5xf32> to vector<2x5xf32>
    %433 = arith.addf %430, %432 : vector<2x5xf32>
    %c0_168 = arith.constant 0 : index
    %c0_169 = arith.constant 0 : index
    %434 = vector.load %arg20[%c0_168, %c0_169] : memref<2x5xf32, #tpu.memory_space<vmem>>, vector<2x5xf32>
    tpu.vector_store %arg20[%c0_168, %c0_169], %433 {strides = array<i32>} : memref<2x5xf32, #tpu.memory_space<vmem>>, vector<2x5xf32>,
    return
  }
}

</mosaic_0001>

<bundles_post_ra>
// kernel: camembert_multilabel_forward.1
= control target key start
LH: loop header
LB: loop body
LE: loop exit
PB: predicated region body
PF: predicated region fallthrough
CT: control target
= control target key end

     0   :  { %s4896_s0 = inlined_call_operand.vmem [shape: f32[16,128], index: 0, kind: input, shape index: {}]   ;;  %s4897_s1 = inlined_call_operand.vmem [shape: f32[2,8], index: 1, kind: input, shape index: {}]   ;;  %s4898_s2 = inlined_call_operand.vmem [shape: f32[1,128], index: 2, kind: input, shape index: {}]   ;;  %s4899_s3 = inlined_call_operand.hbm [shape: f32[1,128], index: 3, kind: input, shape index: {}]   ;;  %s4900_s4 = inlined_call_operand.hbm [shape: bf16[2,128,384], index: 4, kind: input, shape index: {}]   ;;  %s4901_s5 = inlined_call_operand.vmem [shape: f32[2,1,384], index: 5, kind: input, shape index: {}]   ;;  %s4902_s6 = inlined_call_operand.vmem [shape: bf16[2,128,128], index: 6, kind: input, shape index: {}]   ;;  %s4903_s7 = inlined_call_operand.hbm [shape: f32[2,1,128], index: 7, kind: input, shape index: {}]   ;;  %s4904_s8 = inlined_call_operand.hbm [shape: f32[2,1,128], index: 8, kind: input, shape index: {}]   ;;  %s4905_s9 = inlined_call_operand.hbm [shape: f32[2,1,128], index: 9, kind: input, shape index: {}]   ;;  %s4906_s10 = inlined_call_operand.vmem [shape: bf16[2,128,256], index: 10, kind: input, shape index: {}]   ;;  %s4907_s11 = inlined_call_operand.vmem [shape: f32[2,1,256], index: 11, kind: input, shape index: {}]   ;;  %s4908_s12 = inlined_call_operand.hbm [shape: bf16[2,256,128], index: 12, kind: input, shape index: {}]   ;;  %s4909_s13 = inlined_call_operand.hbm [shape: f32[2,1,128], index: 13, kind: input, shape index: {}]   ;;  %s4910_s14 = inlined_call_operand.vmem [shape: f32[2,1,128], index: 14, kind: input, shape index: {}]   ;;  %s4911_s15 = inlined_call_operand.hbm [shape: f32[2,1,128], index: 15, kind: input, shape index: {}]   ;;  %s4912_s16 = inlined_call_operand.vmem [shape: bf16[128,128], index: 16, kind: input, shape index: {}]   ;;  %s4913_s17 = inlined_call_operand.vmem [shape: f32[1,128], index: 17, kind: input, shape index: {}]   ;;  %s4914_s18 = inlined_call_operand.vmem [shape: bf16[128,5], index: 18, kind: input, shape index: {}]   ;;  %s4915_s19 = inlined_call_operand.hbm [shape: f32[1,5], index: 19, kind: input, shape index: {}]   ;;  %s4916_s20 = inlined_call_operand.hbm [shape: f32[2,5], index: 20, kind: output, shape index: {}]  }
   0x1   :  { %4921 = sst [smem:[#allocation24_spill]] %s4896_s0 }
   0x2   :  { %4922 = sst [smem:[#allocation25_spill]] %s4897_s1 }
   0x3   :  { %4923 = sst [smem:[#allocation26_spill]] %s4898_s2 }
   0x4   :  { %4924 = sst [smem:[#allocation27_spill]] %s4899_s3 }
   0x5   :  { %4925 = sst [smem:[#allocation28_spill]] %s4900_s4 }
   0x6   :  { %4926 = sst [smem:[#allocation29_spill]] %s4913_s17 }
   0x7   :  { %4927 = sst [smem:[#allocation30_spill]] %s4916_s20 }
   0x8   :  { %25 = vsyncpa [#allocation3], 0 }
   0x9   :  { %26 = vsyncpa [#allocation6], 0 }
   0xa   :  { %27 = vsyncpa [#allocation9], 0 }
   0xb   :  { %28 = vsyncpa [#allocation12], 0 }
   0xc   :  { %29 = vsyncpa [#allocation15], 0 }
   0xd   :  { %30 = vsyncpa [#allocation4], 0  ;;  %s4133_s1 = smov [#allocation5]   ;;  %s4928_s2 = sld [smem:[#allocation28_spill]] }
   0xe   :  { %s52_s22 = sshll.u32 %s4133_s1, 4  ;;  %s53_s22 = int_to_ptr.vmem [resolvable:$true] %s52_s22 }
  0x13   :  { %s3901_s25 = scalar_lea.hbm %s4928_s2, 6144 }
  0x14   :  { %p3902_p0 = scmp.ne.s32.totalorder %s4928_s2, %s3901_s25  ;;  %p3905_p1 = scmp.lt.u32.totalorder %s3901_s25, %s4928_s2 }
  0x16   :  { %p3907_p2 = pnand %p3905_p1, %p3902_p0 }
  0x18   :  { %3910 = shalt.err (!%p3907_p2)
}
  0x19   :  { %s3911_s4 = scalar_lea.vmem %s53_s22, 6144  ;;  %p3916_p4 = scmp.lt.s32.totalorder %s53_s22, %s53_s22 }
  0x1a   :  { %p3912_p3 = scmp.ne.s32.totalorder %s53_s22, %s3911_s4  ;;  %p3917_p5 = scmp.lt.s32.totalorder %s3911_s4, %s3911_s4 }
  0x1c   :  { %p3918_p6 = por %p3917_p5, %p3916_p4 }
  0x1e   :  { %p3919_p7 = pnand %p3918_p6, %p3912_p3 }
  0x20   :  { %3922 = shalt.err (!%p3919_p7)
}
  0x21   :  { %s4134_s29 = smov 192   ;;  %s4135_s30 = smov 12  }
  0x22   :  { %58 = dma.hbm_to_vmem [thread:$0]  %s4928_s2, 6144, %s53_s22, [#allocation6], %s4134_s29, %s4134_s29, %s4135_s30  }
  0x23   :  { %s4136_s1 = smov [#allocation8]   ;;  %s4137_s24 = smov [#allocation11]  }
  0x24   :  { %s80_s23 = sshll.u32 %s4136_s1, 4  ;;  %s108_s25 = sshll.u32 %s4137_s24, 4  ;;  %s81_s23 = int_to_ptr.vmem [resolvable:$true] %s80_s23  ;;  %s109_s25 = int_to_ptr.vmem [resolvable:$true] %s108_s25 }
  0x25   :  { %s3923_s27 = scalar_lea.hbm %s4904_s8, 32 }
  0x26   :  { %p3924_p8 = scmp.ne.s32.totalorder %s4904_s8, %s3923_s27  ;;  %p3927_p9 = scmp.lt.u32.totalorder %s3923_s27, %s4904_s8 }
  0x28   :  { %p3929_p10 = pnand %p3927_p9, %p3924_p8 }
  0x2a   :  { %3932 = shalt.err (!%p3929_p10)
}
  0x2b   :  { %s3933_s22 = scalar_lea.vmem %s81_s23, 32  ;;  %p3938_p12 = scmp.lt.s32.totalorder %s81_s23, %s81_s23 }
  0x2c   :  { %p3934_p11 = scmp.ne.s32.totalorder %s81_s23, %s3933_s22  ;;  %p3939_p13 = scmp.lt.s32.totalorder %s3933_s22, %s3933_s22 }
  0x2e   :  { %p3940_p0 = por %p3939_p13, %p3938_p12 }
  0x30   :  { %p3941_p1 = pnand %p3940_p0, %p3934_p11 }
  0x32   :  { %3944 = shalt.err (!%p3941_p1)
}
  0x33   :  { %s4138_s2 = smov 16   ;;  %s4139_s29 = smov 1  }
  0x34   :  { %86 = dma.hbm_to_vmem [thread:$0]  %s4904_s8, 32, %s81_s23, [#allocation9], %s4138_s2, %s4138_s2, %s4139_s29  }
  0x35   :  { %s3945_s21 = scalar_lea.hbm %s4908_s12, 4096 }
  0x36   :  { %p3946_p2 = scmp.ne.s32.totalorder %s4908_s12, %s3945_s21  ;;  %p3949_p3 = scmp.lt.u32.totalorder %s3945_s21, %s4908_s12 }
  0x38   :  { %p3951_p4 = pnand %p3949_p3, %p3946_p2 }
  0x3a   :  { %3954 = shalt.err (!%p3951_p4)
}
  0x3b   :  { %s3955_s27 = scalar_lea.vmem %s109_s25, 4096  ;;  %p3960_p6 = scmp.lt.s32.totalorder %s109_s25, %s109_s25 }
  0x3c   :  { %p3956_p5 = scmp.ne.s32.totalorder %s109_s25, %s3955_s27  ;;  %p3961_p7 = scmp.lt.s32.totalorder %s3955_s27, %s3955_s27 }
  0x3e   :  { %p3962_p8 = por %p3961_p7, %p3960_p6 }
  0x40   :  { %p3963_p9 = pnand %p3962_p8, %p3956_p5 }
  0x42   :  { %3966 = shalt.err (!%p3963_p9)
}
  0x43   :  { %s4140_s8 = smov 64   ;;  %s4141_s23 = smov 4  }
  0x44   :  { %114 = dma.hbm_to_vmem [thread:$0]  %s4908_s12, 4096, %s109_s25, [#allocation12], %s4140_s8, %s4140_s8, %s4141_s23  }
  0x45   :  { %s4142_s22 = smov [#allocation14]   ;;  %s4143_s0 = smov [#allocation2]  }
  0x46   :  { %s134_s30 = sshll.u32 %s4142_s22, 4  ;;  %s43_s17 = sshll.u32 %s4143_s0, 4  ;;  %s135_s30 = int_to_ptr.vmem [resolvable:$true] %s134_s30  ;;  %s44_s17 = int_to_ptr.vmem [resolvable:$true] %s43_s17 }
  0x47   :  { %s3967_s1 = scalar_lea.hbm %s4911_s15, 32 }
  0x48   :  { %p3968_p10 = scmp.ne.s32.totalorder %s4911_s15, %s3967_s1  ;;  %p3971_p11 = scmp.lt.u32.totalorder %s3967_s1, %s4911_s15 }
  0x4a   :  { %p3973_p12 = pnand %p3971_p11, %p3968_p10 }
  0x4c   :  { %3976 = shalt.err (!%p3973_p12)
}
  0x4d   :  { %s3977_s12 = scalar_lea.vmem %s135_s30, 32  ;;  %p3982_p0 = scmp.lt.s32.totalorder %s135_s30, %s135_s30 }
  0x4e   :  { %p3978_p13 = scmp.ne.s32.totalorder %s135_s30, %s3977_s12  ;;  %p3983_p1 = scmp.lt.s32.totalorder %s3977_s12, %s3977_s12 }
  0x50   :  { %p3984_p2 = por %p3983_p1, %p3982_p0 }
  0x52   :  { %p3985_p3 = pnand %p3984_p2, %p3978_p13 }
  0x54   :  { %3988 = shalt.err (!%p3985_p3)
}
  0x55   :  { %140 = dma.hbm_to_vmem [thread:$0]  %s4911_s15, 32, %s135_s30, [#allocation15], %s4138_s2, %s4138_s2, %s4139_s29  }
  0x56   :  { %s4929_s22 = sld [smem:[#allocation27_spill]] }
  0x5c   :  { %s3989_s0 = scalar_lea.hbm %s4929_s22, 16 }
  0x5d   :  { %p3990_p4 = scmp.ne.s32.totalorder %s4929_s22, %s3989_s0  ;;  %p3993_p5 = scmp.lt.u32.totalorder %s3989_s0, %s4929_s22 }
  0x5f   :  { %p3995_p6 = pnand %p3993_p5, %p3990_p4 }
  0x61   :  { %3998 = shalt.err (!%p3995_p6)
}
  0x62   :  { %s3999_s3 = scalar_lea.vmem %s44_s17, 16  ;;  %s4003_s26 = scalar_lea.vmem %s44_s17, 32 }
  0x63   :  { %p4000_p7 = scmp.ne.s32.totalorder %s44_s17, %s3999_s3  ;;  %p4004_p8 = scmp.lt.s32.totalorder %s44_s17, %s44_s17 }
  0x64   :  { %p4005_p9 = scmp.lt.s32.totalorder %s4003_s26, %s3999_s3 }
  0x66   :  { %p4006_p10 = por %p4005_p9, %p4004_p8 }
  0x68   :  { %p4007_p11 = pnand %p4006_p10, %p4000_p7 }
  0x6a   :  { %4010 = shalt.err (!%p4007_p11)
}
  0x6b   :  { %46 = dma.hbm_to_vmem [thread:$0]  %s4929_s22, 16, %s44_s17, [#allocation3]  }
  0x6c   :  { %s4144_s27 = smov [#allocation7]   ;;  %s4145_s25 = smov [#allocation10]  }
  0x6d   :  { %s68_s12 = sshll.u32 %s4144_s27, 4  ;;  %s92_s23 = sshll.u32 %s4145_s25, 4  ;;  %s69_s12 = int_to_ptr.vmem [resolvable:$true] %s68_s12  ;;  %s93_s23 = int_to_ptr.vmem [resolvable:$true] %s92_s23 }
  0x6e   :  { %s4011_s0 = scalar_lea.hbm %s4903_s7, 32 }
  0x6f   :  { %p4012_p12 = scmp.ne.s32.totalorder %s4903_s7, %s4011_s0  ;;  %p4015_p13 = scmp.lt.u32.totalorder %s4011_s0, %s4903_s7 }
  0x71   :  { %p4017_p0 = pnand %p4015_p13, %p4012_p12 }
  0x73   :  { %4020 = shalt.err (!%p4017_p0)
}
  0x74   :  { %s4021_s17 = scalar_lea.vmem %s69_s12, 32  ;;  %p4026_p2 = scmp.lt.s32.totalorder %s69_s12, %s69_s12 }
  0x75   :  { %p4022_p1 = scmp.ne.s32.totalorder %s69_s12, %s4021_s17  ;;  %p4027_p3 = scmp.lt.s32.totalorder %s4021_s17, %s4021_s17 }
  0x77   :  { %p4028_p4 = por %p4027_p3, %p4026_p2 }
  0x79   :  { %p4029_p5 = pnand %p4028_p4, %p4022_p1 }
  0x7b   :  { %4032 = shalt.err (!%p4029_p5)
}
  0x7c   :  { %74 = dma.hbm_to_vmem [thread:$0]  %s4903_s7, 32, %s69_s12, [#allocation6], %s4138_s2, %s4138_s2, %s4139_s29  }
  0x7d   :  { %s4033_s30 = scalar_lea.hbm %s4905_s9, 32 }
  0x7e   :  { %p4034_p6 = scmp.ne.s32.totalorder %s4905_s9, %s4033_s30  ;;  %p4037_p7 = scmp.lt.u32.totalorder %s4033_s30, %s4905_s9 }
  0x80   :  { %p4039_p8 = pnand %p4037_p7, %p4034_p6 }
  0x82   :  { %4042 = shalt.err (!%p4039_p8)
}
  0x83   :  { %s4043_s0 = scalar_lea.vmem %s93_s23, 32  ;;  %p4048_p10 = scmp.lt.s32.totalorder %s93_s23, %s93_s23 }
  0x84   :  { %p4044_p9 = scmp.ne.s32.totalorder %s93_s23, %s4043_s0  ;;  %p4049_p11 = scmp.lt.s32.totalorder %s4043_s0, %s4043_s0 }
  0x86   :  { %p4050_p12 = por %p4049_p11, %p4048_p10 }
  0x88   :  { %p4051_p13 = pnand %p4050_p12, %p4044_p9 }
  0x8a   :  { %4054 = shalt.err (!%p4051_p13)
}
  0x8b   :  { %98 = dma.hbm_to_vmem [thread:$0]  %s4905_s9, 32, %s93_s23, [#allocation9], %s4138_s2, %s4138_s2, %s4139_s29  }
  0x8c   :  { %s4146_s20 = smov [#allocation13]   ;;  %s4147_s1 = smov [#allocation16]  }
  0x8d   :  { %s120_s21 = sshll.u32 %s4146_s20, 4  ;;  %s153_s24 = sshll.u32 %s4147_s1, 4  ;;  %s121_s21 = int_to_ptr.vmem [resolvable:$true] %s120_s21  ;;  %s154_s24 = int_to_ptr.vmem [resolvable:$true] %s153_s24 }
  0x8e   :  { %s4055_s3 = scalar_lea.hbm %s4909_s13, 32 }
  0x8f   :  { %p4056_p0 = scmp.ne.s32.totalorder %s4909_s13, %s4055_s3  ;;  %p4059_p1 = scmp.lt.u32.totalorder %s4055_s3, %s4909_s13 }
  0x91   :  { %p4061_p2 = pnand %p4059_p1, %p4056_p0 }
  0x93   :  { %4064 = shalt.err (!%p4061_p2)
}
  0x94   :  { %s4065_s9 = scalar_lea.vmem %s121_s21, 32  ;;  %p4070_p4 = scmp.lt.s32.totalorder %s121_s21, %s121_s21 }
  0x95   :  { %p4066_p3 = scmp.ne.s32.totalorder %s121_s21, %s4065_s9  ;;  %p4071_p5 = scmp.lt.s32.totalorder %s4065_s9, %s4065_s9 }
  0x97   :  { %p4072_p6 = por %p4071_p5, %p4070_p4 }
  0x99   :  { %p4073_p7 = pnand %p4072_p6, %p4066_p3 }
  0x9b   :  { %4076 = shalt.err (!%p4073_p7)
}
  0x9c   :  { %126 = dma.hbm_to_vmem [thread:$0]  %s4909_s13, 32, %s121_s21, [#allocation12], %s4138_s2, %s4138_s2, %s4139_s29  }
  0x9d   :  { %s4077_s0 = scalar_lea.hbm %s4915_s19, 16 }
  0x9e   :  { %p4078_p8 = scmp.ne.s32.totalorder %s4915_s19, %s4077_s0  ;;  %p4081_p9 = scmp.lt.u32.totalorder %s4077_s0, %s4915_s19 }
  0xa0   :  { %p4083_p10 = pnand %p4081_p9, %p4078_p8 }
  0xa2   :  { %4086 = shalt.err (!%p4083_p10)
}
  0xa3   :  { %s4087_s17 = scalar_lea.vmem %s154_s24, 16  ;;  %s4091_s22 = scalar_lea.vmem %s154_s24, 32 }
  0xa4   :  { %p4088_p11 = scmp.ne.s32.totalorder %s154_s24, %s4087_s17  ;;  %p4092_p12 = scmp.lt.s32.totalorder %s154_s24, %s154_s24 }
  0xa5   :  { %p4093_p13 = scmp.lt.s32.totalorder %s4091_s22, %s4087_s17 }
  0xa7   :  { %p4094_p0 = por %p4093_p13, %p4092_p12 }
  0xa9   :  { %p4095_p1 = pnand %p4094_p0, %p4088_p11 }
  0xab   :  { %4098 = shalt.err (!%p4095_p1)
}
  0xac   :  { %156 = dma.hbm_to_vmem [thread:$0]  %s4915_s19, 16, %s154_s24, [#allocation15]  }
  0xad   :  { %4121 = dma.done.wait [#allocation3], 16  }
  0xae   :  { %4122 = vsyncadd [#allocation3], 4294967280 }
  0xaf   :  { %4123 = dma.done.wait [#allocation6], 6176  }
  0xb0   :  { %4124 = vsyncadd [#allocation6], 4294961120 }
  0xb1   :  { %4125 = dma.done.wait [#allocation9], 64  }
  0xb2   :  { %4126 = vsyncadd [#allocation9], 4294967232 }
  0xb3   :  { %4127 = dma.done.wait [#allocation12], 4128  }
  0xb4   :  { %4128 = vsyncadd [#allocation12], 4294963168 }
  0xb5   :  { %4129 = dma.done.wait [#allocation15], 48  }
  0xb6   :  { %4130 = vsyncadd [#allocation15], 4294967248  ;;  %s4930_s3 = sld [smem:[#allocation24_spill]]  ;;  %v3655_v2 = vld [vmem:[#allocation5 + $0x4] ss:$12 sps:$4 sm:$0xff]   ;;  %v4148_v4 = vmov 0.0   ;;  %v264_v53 = vlaneseq }
  0xb7   :  { %v3657_v3 = vld [vmem:[#allocation5] ss:$12 sps:$4 sm:$0xff]   ;;  %3410 = vmatprep.subr.bf16.mxu1 %v4148_v4  ;;  %v3658_v5 = vld [vmem:[#allocation5 + $0x8] ss:$12 sps:$4 sm:$0xff]   ;;  %407 = vmatprep.subr.bf16.mxu0 %v3655_v2  ;;  %v3661_v15 = vld [vmem:[#allocation5 + $0x18] ss:$12 sps:$4 sm:$0xff]  }
  0xb8   :  { %v3659_v6 = vld [vmem:[#allocation5 + $0x1c] ss:$12 sps:$4 sm:$0xff]   ;;  %408 = vmatpush1.bf16.msra.mxu0 %v3657_v3  ;;  %3411 = vmatpush3.bf16.msra.mxu1 %v3658_v5  ;;  %v3662_v16 = vld [vmem:[#allocation5 + $0x20] ss:$12 sps:$4 sm:$0xff]   ;;  %v3666_v19 = vld [vmem:[#allocation5 + $0x38] ss:$12 sps:$4 sm:$0xff]  }
  0xb9   :  { %409 = vmatprep.subr.bf16.mxu0 %v3659_v6  ;;  %3412 = vmatprep.subr.bf16.mxu1 %v4148_v4  ;;  %v3663_v17 = vld [vmem:[#allocation5 + $0x34] ss:$12 sps:$4 sm:$0xff]   ;;  %v3665_v18 = vld [vmem:[#allocation5 + $0x30] ss:$12 sps:$4 sm:$0xff]   ;;  %v3667_v20 = vld [vmem:[#allocation5 + $0x4c] ss:$12 sps:$4 sm:$0xff]  }
  0xba   :  { %v3669_v21 = vld [vmem:[#allocation5 + $0x48] ss:$12 sps:$4 sm:$0xff]   ;;  %v3670_v22 = vld [vmem:[#allocation5 + $0x50] ss:$12 sps:$4 sm:$0xff]   ;;  %v3673_v24 = vld [vmem:[#allocation5 + $0x60] ss:$12 sps:$4 sm:$0xff]  }
  0xbb   :  { %v3671_v23 = vld [vmem:[#allocation5 + $0x64] ss:$12 sps:$4 sm:$0xff]   ;;  %v3674_v25 = vld [vmem:[#allocation5 + $0x68] ss:$12 sps:$4 sm:$0xff]   ;;  %v3678_v28 = vld [vmem:[#allocation5 + $0x80] ss:$12 sps:$4 sm:$0xff]  }
  0xbc   :  { %v186_v0 = vld [vmem:[%s4930_s3] sm:$0xff]  ;;  %v187_v1 = vld [vmem:[%s4930_s3 + $0x8] sm:$0xff]  ;;  %410 = vmatpush1.bf16.msra.mxu0 %v3661_v15  ;;  %3413 = vmatpush3.bf16.msra.mxu1 %v3662_v16  ;;  %v4149_v30 = vmov 0   ;;  %vm4150_vm0 = vmmov 0   ;;  %s4931_s30 = sld [smem:[#allocation26_spill]]  ;;  %v4424_v54 = vshrl.u32 %v264_v53, 7 }
  0xbd   :  { %190 = vadd.xlane.f32.xlu0 %v186_v0  ;;  %3414 = vmatprep.subr.bf16.mxu1 %v4148_v4  ;;  %v3675_v26 = vld [vmem:[#allocation5 + $0x7c] ss:$12 sps:$4 sm:$0xff]   ;;  %v3677_v27 = vld [vmem:[#allocation5 + $0x78] ss:$12 sps:$4 sm:$0xff]   ;;  %v3679_v29 = vld [vmem:[#allocation5 + $0x94] ss:$12 sps:$4 sm:$0xff]  }
  0xbe   :  { %411 = vmatprep.subr.bf16.mxu0 %v3663_v17  ;;  %439 = vmatprep.mubr.bf16.mxu0 %v4149_v30  ;;  %v3681_v31 = vld [vmem:[#allocation5 + $0x90] ss:$12 sps:$4 sm:$0xff]   ;;  %v3682_v32 = vld [vmem:[#allocation5 + $0x98] ss:$12 sps:$4 sm:$0xff]   ;;  %v3685_v34 = vld [vmem:[#allocation5 + $0xa8] ss:$12 sps:$4 sm:$0xff]  }
  0xbf   :  { %3426 = vmatprep.mubr.msk.bf16.mxu1 %vm4150_vm0, %v4148_v4  ;;  %v3683_v33 = vld [vmem:[#allocation5 + $0xac] ss:$12 sps:$4 sm:$0xff]   ;;  %v3686_v35 = vld [vmem:[#allocation5 + $0xb0] ss:$12 sps:$4 sm:$0xff]   ;;  %v4427_v55 = vsub.s32 1, %v4424_v54  ;;  %v274_v57 = vsub.s32 2, %v4424_v54 }
  0xc0   :  { %412 = vmatpush1.bf16.msra.mxu0 %v3665_v18  ;;  %3415 = vmatpush3.bf16.msra.mxu1 %v3666_v19  ;;  %v3070_v48 = vld [vmem:[#allocation2] ss:$0 sm:$0xff]  ;;  %v4435_v59 = vsub.s32 0, %v4424_v54  ;;  %vm493_vm1 = vcmask 523264   ;;  %vm563_vm2 = vcmask 1043456   ;;  %s4932_s28 = sld [smem:[#allocation25_spill]] }
  0xc1   :  { %192 = vadd.xlane.f32.xlu0 %v187_v1  ;;  %3416 = vmatprep.subr.bf16.mxu1 %v4148_v4  ;;  %v262_v56 = vld [vmem:[%s4901_s5] sm:$0x7]  ;;  %vm546_vm3 = vcmask 64512   ;;  %vm2821_vm4 = vcmask 1040384   ;;  %s4933_s2 = sld [smem:[#allocation29_spill]]  ;;  %s4151_s29 = smov [#allocation17]  }
  0xc2   :  { %413 = vmatprep.subr.bf16.mxu0 %v3667_v20  ;;  %v3069_v44 = vld [vmem:[%s4931_s30] ss:$0 sm:$0xff]  ;;  %v271_v58 = vrot.slane %v262_v56, %v4427_v55  ;;  %v275_v62 = vrot.slane %v262_v56, %v274_v57  ;;  %s3056_s21 = sshll.u32 %s4151_s29, 4  ;;  %vm3048_vm5 = vcmask 33792   ;;  %s3057_s21 = int_to_ptr.vmem [resolvable:$true] %s3056_s21 }
  0xc3   :  { %p4104_p3 = scmp.lt.s32.totalorder %s3057_s21, %s3057_s21 }
  0xc4   :  { %414 = vmatpush1.bf16.msra.mxu0 %v3669_v21  ;;  %3417 = vmatpush3.bf16.msra.mxu1 %v3670_v22 }
  0xc5   :  { %3418 = vmatprep.subr.bf16.mxu1 %v4148_v4  ;;  %415 = vmatprep.subr.bf16.mxu0 %v3671_v23 }
  0xc6   :  { %v185_v21 = vld [vmem:[%s4932_s28] sm:$0x3] }
  0xc7   :  { %v4461_v22 = vrot.slane %v185_v21, %v4435_v59 }
  0xc8   :  { %416 = vmatpush1.bf16.msra.mxu0 %v3673_v24  ;;  %3419 = vmatpush3.bf16.msra.mxu1 %v3674_v25 }
  0xc9   :  { %417 = vmatprep.subr.bf16.mxu0 %v3675_v26  ;;  %3420 = vmatprep.subr.bf16.mxu1 %v4148_v4 }
  0xcc   :  { %418 = vmatpush1.bf16.msra.mxu0 %v3677_v27  ;;  %3421 = vmatpush3.bf16.msra.mxu1 %v3678_v28 }
  0xcd   :  { %419 = vmatprep.subr.bf16.mxu0 %v3679_v29  ;;  %3422 = vmatprep.subr.bf16.mxu1 %v4148_v4 }
  0xd0   :  { %420 = vmatpush1.bf16.msra.mxu0 %v3681_v31  ;;  %3423 = vmatpush3.bf16.msra.mxu1 %v3682_v32 }
  0xd1   :  { %421 = vmatprep.subr.bf16.mxu0 %v3683_v33  ;;  %3424 = vmatprep.subr.bf16.mxu1 %v4148_v4 }
  0xd4   :  { %422 = vmatpush1.bf16.msra.mxu0 %v3685_v34  ;;  %3425 = vmatpush3.bf16.msra.mxu1 %v3686_v35 }
  0xd5   :  { %3430 = vmatprep.subr.bf16.mxu1 %v4148_v4  ;;  %3454 = vmatprep.subr.bf16.mxu0 %v4148_v4 }
 0x14a   :  { %v191_v7 = vpop.xlane.xlu0 %190 }
 0x14b   :  { %v195_v8 = vmul.f32 0.0078125, %v191_v7 }
 0x14d   :  { %v4390_v9 = vsub.f32 %v186_v0, %v195_v8  ;;  %v267_v8 = vrot.slane %v262_v56, %v4435_v59 }
 0x14e   :  { %v193_v10 = vpop.xlane.xlu0 %192 }
 0x14f   :  { %v196_v11 = vmul.f32 0.0078125, %v193_v10  ;;  %v199_v12 = vmul.f32 %v4390_v9, %v4390_v9 }
 0x151   :  { %v4394_v13 = vsub.f32 %v187_v1, %v196_v11  ;;  %201 = vadd.xlane.f32.xlu1 %v199_v12 }
 0x153   :  { %v200_v14 = vmul.f32 %v4394_v13, %v4394_v13 }
 0x155   :  { %203 = vadd.xlane.f32.xlu1 %v200_v14 }
 0x1de   :  { %v202_v36 = vpop.xlane.xlu1 %201 }
 0x1df   :  { %v205_v37 = vmul.f32 0.0078125, %v202_v36 }
 0x1e1   :  { %v207_v38 = vadd.f32 1e-05, %v205_v37 }
 0x1e2   :  { %v204_v39 = vpop.xlane.xlu1 %203 }
 0x1e3   :  { %3831 = vrsqrt.f32 %v207_v38  ;;  %v206_v40 = vmul.f32 0.0078125, %v204_v39 }
 0x1e5   :  { %v208_v41 = vadd.f32 1e-05, %v206_v40 }
 0x1e7   :  { %3833 = vrsqrt.f32 %v208_v41  ;;  %v4471_v41 = vrot.slane %v185_v21, %v4427_v55 }
 0x1ed   :  { %v3832_v42 = vpop.eup %3831 }
 0x1ee   :  { %v211_v43 = vmul.f32 %v3832_v42, %v4390_v9 }
 0x1f0   :  { %v219_v47 = vmul.f32 %v3069_v44, %v211_v43 }
 0x1f1   :  { %v3834_v45 = vpop.eup %3833 }
 0x1f2   :  { %v212_v46 = vmul.f32 %v3834_v45, %v4394_v13  ;;  %v4414_v50 = vadd.f32 %v3070_v48, %v219_v47 }
 0x1f4   :  { %v220_v49 = vmul.f32 %v3069_v44, %v212_v46 }
 0x1f6   :  { %v4416_v51 = vadd.f32 %v3070_v48, %v220_v49 }
 0x1f8   :  { %v261_v52 = vpack.c.bf16 %v4416_v51, %v4414_v50 }
 0x1fa   :  { %440 = vmatmul.mubr.bf16.vlgmr.msra.gmra.mrb[0].mxu0 %v261_v52  ;;  %3427 = vmatmul.mubr.bf16.vlgmr.msra.gmra.mrb[0].mxu1 %v261_v52 }
 0x1fb   :  { %3432 = vmatprep.mubr.msk.bf16.mxu1 %vm4150_vm0, %v4148_v4  ;;  %3456 = vmatprep.mubr.msk.bf16.mxu0 %vm4150_vm0, %v4148_v4 }
 0x2cd   :  { %v441_v60 = vpop.f32.mrb[0].mxu0  ;;  %v484_v61 = vpop.f32.mrb[0].mxu1 }
 0x2ce   :  { %v443_v63 = vpop.f32.mrb[1].mxu0  ;;  %v3428_v0 = vpop.f32.mrb[1].mxu1  ;;  %v485_v11 = vadd.f32 %v484_v61, %v275_v62  ;;  %v442_v14 = vadd.f32 %v441_v60, %v267_v8 }
 0x2cf   :  { %v444_v1 = vadd.f32 %v443_v63, %v271_v58  ;;  %v445_v2 = vpop.f32.mrb[2].mxu0  ;;  %v487_v3 = vpop.f32.mrb[2].mxu1 }
 0x2d0   :  { %v4439_v5 = vadd.f32 %v487_v3, %v275_v62  ;;  %v447_v6 = vpop.f32.mrb[3].mxu0  ;;  %v3429_v7 = vpop.f32.mrb[3].mxu1  ;;  %v4445_v16 = vpack.c.bf16 %v485_v11, %v485_v11  ;;  %v446_v17 = vadd.f32 %v445_v2, %v267_v8  ;;  %v491_v18 = vpack.c.bf16 %v442_v14, %v442_v14 }
 0x2d1   :  { %v492_v9 = vpack.c.bf16 %v444_v1, %v444_v1  ;;  %v448_v10 = vadd.f32 %v447_v6, %v271_v58 }
 0x2d2   :  { %v565_v19 = vsel %vm563_vm2, %v4445_v16, 0  ;;  %v727_v20 = vpack.c.bf16 %v446_v17, %v446_v17 }
 0x2d3   :  { %v498_v12 = vsel %vm493_vm1, %v492_v9, 0  ;;  %v728_v13 = vpack.c.bf16 %v448_v10, %v448_v10 }
 0x2d4   :  { %3431 = vmatpush3.bf16.xpose.msra.mxu1 %v498_v12 }
 0x2d5   :  { %v733_v15 = vsel %vm493_vm1, %v728_v13, 0  ;;  %3436 = vmatprep.subr.bf16.mxu1 %v4148_v4 }
 0x2d6   :  { %3455 = vmatpush3.bf16.xpose.msra.mxu0 %v733_v15 }
 0x2d7   :  { %3466 = vmatprep.subr.bf16.mxu0 %v4148_v4 }
 0x2db   :  { %3433 = vmatmul.mubr.msk.bf16.vlgmr.msra.gmra.mrb[4].mxu1 %vm493_vm1, %v491_v18 }
 0x2dc   :  { %3437 = vmatpush3.bf16.msra.mxu1 %v565_v19  ;;  %3438 = vmatprep.mubr.msk.bf16.mxu1 %vm4150_vm0, %v4148_v4 }
 0x2dd   :  { %3457 = vmatmul.mubr.msk.bf16.vlgmr.msra.gmra.mrb[4].mxu0 %vm493_vm1, %v727_v20  ;;  %3442 = vmatprep.subr.bf16.mxu1 %v4148_v4 }
 0x2de   :  { %3468 = vmatprep.mubr.msk.bf16.mxu0 %vm4150_vm0, %v4148_v4 }
 0x3ae   :  { %v534_v23 = vpop.f32.mrb[4].mxu1 }
 0x3af   :  { %v540_v24 = vmul.f32 0.125, %v534_v23  ;;  %v3434_v25 = vpop.f32.mrb[5].mxu1 }
 0x3b0   :  { %v537_v26 = vpop.f32.mrb[6].mxu1  ;;  %v769_v27 = vpop.f32.mrb[4].mxu0 }
 0x3b1   :  { %v3435_v28 = vpop.f32.mrb[7].mxu1  ;;  %v3458_v29 = vpop.f32.mrb[5].mxu0  ;;  %v545_v31 = vadd.f32 %v4461_v22, %v540_v24  ;;  %v775_v40 = vmul.f32 0.125, %v769_v27 }
 0x3b2   :  { %v772_v32 = vpop.f32.mrb[6].mxu0 }
 0x3b3   :  { %v3459_v33 = vpop.f32.mrb[7].mxu0  ;;  %v547_v34 = vsel %vm546_vm3, %v545_v31, -inf  ;;  %v780_v42 = vadd.f32 %v4471_v41, %v775_v40 }
 0x3b4   :  { %548 = vmax.xlane.f32.xlu0 %v547_v34  ;;  %v793_v34 = vpack.c.bf16 %v4439_v5, %v4439_v5 }
 0x3b5   :  { %v781_v43 = vsel %vm546_vm3, %v780_v42, -inf }
 0x3ca   :  { %611 = vrot.lane.b32.xlu0 %v492_v9, %s4140_s8 }
 0x441   :  { %v549_v35 = vpop.xlane.xlu0 %548 }
 0x442   :  { %v550_v36 = vsub.f32 %v545_v31, %v549_v35 }
 0x444   :  { %v551_v37 = vmul.f32 1.442695, %v550_v36 }
 0x445   :  { %v612_v52 = vpop.permute.xlu0 %611 }
 0x446   :  { %3835 = vpow2.f32 %v551_v37  ;;  %v617_v56 = vsel %vm493_vm1, %v612_v52, 0 }
 0x450   :  { %v3836_v38 = vpop.eup %3835 }
 0x451   :  { %v553_v39 = vsel %vm546_vm3, %v3836_v38, 0.0 }
 0x452   :  { %554 = vadd.xlane.f32.xlu1 %v553_v39 }
 0x463   :  { %608 = vrot.lane.b32.xlu1 %v491_v18, %s4140_s8 }
 0x467   :  { %844 = vrot.lane.b32.xlu1 %v728_v13, %s4140_s8 }
 0x46b   :  { %841 = vrot.lane.b32.xlu1 %v727_v20, %s4140_s8 }
 0x48f   :  { %782 = vmax.xlane.f32.xlu1 %v781_v43 }
 0x4df   :  { %v555_v44 = vpop.xlane.xlu1 %554 }
 0x4e0   :  { %3837 = vrcp.f32 %v555_v44  ;;  %v798_v44 = vsel %vm563_vm2, %v793_v34, 0 }
 0x4e3   :  { %v609_v45 = vpop.permute.xlu1 %608 }
 0x4e7   :  { %v845_v46 = vpop.permute.xlu1 %844 }
 0x4e8   :  { %v850_v47 = vsel %vm493_vm1, %v845_v46, 0 }
 0x4e9   :  { %3467 = vmatpush3.bf16.xpose.msra.mxu0 %v850_v47 }
 0x4ea   :  { %v3838_v48 = vpop.eup %3837  ;;  %3478 = vmatprep.subr.bf16.mxu0 %v4148_v4 }
 0x4eb   :  { %v557_v49 = vmul.f32 %v3838_v48, %v3836_v38  ;;  %v842_v58 = vpop.permute.xlu1 %841 }
 0x4ed   :  { %v558_v53 = vpack.c.bf16 %v557_v49, %v557_v49 }
 0x4ef   :  { %3439 = vmatmul.mubr.msk.bf16.vlgmr.msra.gmra.mrb[8].mxu1 %vm546_vm3, %v558_v53  ;;  %v3687_v53 = vld [vmem:[%s4902_s6] sm:$0xff]  }
 0x4f0   :  { %3443 = vmatpush3.bf16.xpose.msra.mxu1 %v617_v56  ;;  %3469 = vmatmul.mubr.msk.bf16.vlgmr.msra.gmra.mrb[8].mxu0 %vm493_vm1, %v842_v58  ;;  %v3688_v56 = vld [vmem:[%s4902_s6 + $0x8] sm:$0xff]   ;;  %v3689_v58 = vld [vmem:[%s4902_s6 + $0x10] sm:$0xff]  }
 0x4f1   :  { %3444 = vmatprep.mubr.msk.bf16.mxu1 %vm4150_vm0, %v4148_v4  ;;  %3448 = vmatprep.subr.bf16.mxu1 %v4148_v4 }
 0x4f2   :  { %3494 = vmatprep.mubr.msk.bf16.mxu0 %vm4150_vm0, %v4148_v4  ;;  %3479 = vmatpush3.bf16.msra.mxu0 %v3687_v53  ;;  %v3715_v53 = vld [vmem:[%s4906_s10 + $0x64] ss:$8 sps:$4 sm:$0xff]  }
 0x4f3   :  { %3480 = vmatprep.subr.bf16.mxu0 %v4148_v4 }
 0x4f6   :  { %3481 = vmatpush3.bf16.msra.mxu0 %v3688_v56  ;;  %v3713_v56 = vld [vmem:[%s4906_s10 + $0x60] ss:$8 sps:$4 sm:$0xff]  }
 0x4f7   :  { %3445 = vmatmul.mubr.msk.bf16.vlgmr.msra.gmra.mrb[12].mxu1 %vm493_vm1, %v609_v45  ;;  %3482 = vmatprep.subr.bf16.mxu0 %v4148_v4 }
 0x4f8   :  { %3450 = vmatprep.mubr.msk.bf16.mxu1 %vm4150_vm0, %v4148_v4 }
 0x4fa   :  { %3483 = vmatpush3.bf16.msra.mxu0 %v3689_v58  ;;  %v3718_v58 = vld [vmem:[%s4906_s10 + $0x74] ss:$8 sps:$4 sm:$0xff]  }
 0x4fb   :  { %3484 = vmatprep.subr.bf16.mxu0 %v4148_v4 }
 0x51c   :  { %v783_v60 = vpop.xlane.xlu1 %782 }
 0x51d   :  { %v784_v61 = vsub.f32 %v780_v42, %v783_v60  ;;  %v3690_v60 = vld [vmem:[%s4902_s6 + $0x18] sm:$0xff]  }
 0x51e   :  { %3485 = vmatpush3.bf16.msra.mxu0 %v3690_v60  ;;  %v3716_v60 = vld [vmem:[%s4906_s10 + $0x70] ss:$8 sps:$4 sm:$0xff]  }
 0x51f   :  { %v785_v7 = vmul.f32 1.442695, %v784_v61  ;;  %v3691_v61 = vld [vmem:[%s4902_s6 + $0x20] sm:$0xff]   ;;  %3486 = vmatprep.subr.bf16.mxu0 %v4148_v4 }
 0x521   :  { %3839 = vpow2.f32 %v785_v7  ;;  %v3694_v7 = vld [vmem:[%s4902_s6 + $0x38] sm:$0xff]  }
 0x522   :  { %3487 = vmatpush3.bf16.msra.mxu0 %v3691_v61 }
 0x523   :  { %3488 = vmatprep.subr.bf16.mxu0 %v4148_v4 }
 0x52b   :  { %v3840_v20 = vpop.eup %3839 }
 0x52c   :  { %v787_v21 = vsel %vm546_vm3, %v3840_v20, 0.0 }
 0x5c2   :  { %v4488_v62 = vpop.f32.mrb[8].mxu1 }
 0x5c3   :  { %v3440_v63 = vpop.f32.mrb[9].mxu1  ;;  %v886_v0 = vpop.f32.mrb[8].mxu0 }
 0x5c4   :  { %v604_v1 = vpop.f32.mrb[10].mxu1  ;;  %v3470_v2 = vpop.f32.mrb[9].mxu0  ;;  %v892_v10 = vmul.f32 0.125, %v886_v0  ;;  %v3692_v63 = vld [vmem:[%s4902_s6 + $0x28] sm:$0xff]   ;;  %v3693_v0 = vld [vmem:[%s4902_s6 + $0x30] sm:$0xff]  }
 0x5c5   :  { %v3441_v3 = vpop.f32.mrb[11].mxu1  ;;  %v889_v6 = vpop.f32.mrb[10].mxu0  ;;  %3489 = vmatpush3.bf16.msra.mxu0 %v3692_v63 }
 0x5c6   :  { %v3471_v8 = vpop.f32.mrb[11].mxu0  ;;  %v893_v18 = vadd.f32 %v892_v10, %v4471_v41  ;;  %3490 = vmatprep.subr.bf16.mxu0 %v4148_v4 }
 0x5c8   :  { %v894_v19 = vsel %vm546_vm3, %v893_v18, -inf }
 0x5c9   :  { %3491 = vmatpush3.bf16.msra.mxu0 %v3693_v0 }
 0x5ca   :  { %v653_v9 = vpop.f32.mrb[12].mxu1  ;;  %3492 = vmatprep.subr.bf16.mxu0 %v4148_v4 }
 0x5cb   :  { %v659_v11 = vmul.f32 0.125, %v653_v9  ;;  %v3446_v12 = vpop.f32.mrb[13].mxu1 }
 0x5cc   :  { %v656_v13 = vpop.f32.mrb[14].mxu1 }
 0x5cd   :  { %v3447_v14 = vpop.f32.mrb[15].mxu1  ;;  %v660_v15 = vadd.f32 %v659_v11, %v4461_v22  ;;  %3493 = vmatpush3.bf16.msra.mxu0 %v3694_v7 }
 0x5cf   :  { %v661_v17 = vsel %vm546_vm3, %v660_v15, -inf }
 0x5d0   :  { %662 = vmax.xlane.f32.xlu0 %v661_v17 }
 0x5d4   :  { %895 = vmax.xlane.f32.xlu0 %v894_v19 }
 0x5d8   :  { %788 = vadd.xlane.f32.xlu0 %v787_v21 }
 0x65d   :  { %v663_v23 = vpop.xlane.xlu0 %662 }
 0x65e   :  { %v664_v24 = vsub.f32 %v660_v15, %v663_v23 }
 0x660   :  { %v665_v25 = vmul.f32 1.442695, %v664_v24 }
 0x661   :  { %v896_v26 = vpop.xlane.xlu0 %895 }
 0x662   :  { %3841 = vpow2.f32 %v665_v25  ;;  %v897_v27 = vsub.f32 %v893_v18, %v896_v26  ;;  %v3103_v25 = vld [vmem:[#allocation7] ss:$0 sm:$0xff] }
 0x664   :  { %v898_v28 = vmul.f32 1.442695, %v897_v27 }
 0x665   :  { %v789_v35 = vpop.xlane.xlu0 %788 }
 0x666   :  { %3843 = vpow2.f32 %v898_v28 }
 0x66c   :  { %v3842_v29 = vpop.eup %3841 }
 0x66d   :  { %v667_v31 = vsel %vm546_vm3, %v3842_v29, 0.0 }
 0x66e   :  { %668 = vadd.xlane.f32.xlu0 %v667_v31 }
 0x670   :  { %v3844_v32 = vpop.eup %3843 }
 0x671   :  { %v900_v33 = vsel %vm546_vm3, %v3844_v32, 0.0 }
 0x672   :  { %901 = vadd.xlane.f32.xlu1 %v900_v33 }
 0x683   :  { %907 = vrot.lane.b32.xlu1 %v793_v34, %s4140_s8 }
 0x684   :  { %674 = vrot.lane.b32.xlu0 %v4445_v16, %s4140_s8 }
 0x6fb   :  { %v669_v36 = vpop.xlane.xlu0 %668 }
 0x6fc   :  { %3845 = vrcp.f32 %v669_v36  ;;  %v3700_v36 = vld [vmem:[%s4906_s10 + $0x14] ss:$8 sps:$4 sm:$0xff]  }
 0x6fd   :  { %3847 = vrcp.f32 %v789_v35  ;;  %v3695_v35 = vld [vmem:[%s4906_s10] ss:$8 sps:$4 sm:$0xff]  }
 0x6ff   :  { %v675_v37 = vpop.permute.xlu0 %674  ;;  %v902_v39 = vpop.xlane.xlu1 %901 }
 0x700   :  { %v680_v38 = vsel %vm563_vm2, %v675_v37, 0  ;;  %3849 = vrcp.f32 %v902_v39 }
 0x701   :  { %3449 = vmatpush3.bf16.msra.mxu1 %v680_v38 }
 0x702   :  { %3460 = vmatprep.subr.bf16.mxu1 %v4148_v4 }
 0x703   :  { %v908_v45 = vpop.permute.xlu1 %907 }
 0x704   :  { %v913_v48 = vsel %vm563_vm2, %v908_v45, 0  ;;  %v3706_v45 = vld [vmem:[%s4906_s10 + $0x34] ss:$8 sps:$4 sm:$0xff]  }
 0x706   :  { %v3846_v40 = vpop.eup %3845 }
 0x707   :  { %v671_v42 = vmul.f32 %v3846_v40, %v3842_v29  ;;  %v3848_v43 = vpop.eup %3847 }
 0x708   :  { %v791_v16 = vmul.f32 %v3848_v43, %v3840_v20 }
 0x709   :  { %v672_v5 = vpack.c.bf16 %v671_v42, %v671_v42 }
 0x70a   :  { %v792_v46 = vpack.c.bf16 %v791_v16, %v791_v16  ;;  %v3850_v47 = vpop.eup %3849  ;;  %v3701_v16 = vld [vmem:[%s4906_s10 + $0x20] ss:$8 sps:$4 sm:$0xff]  }
 0x70b   :  { %3451 = vmatmul.mubr.msk.bf16.vlgmr.msra.gmra.mrb[16].mxu1 %vm546_vm3, %v672_v5  ;;  %v904_v49 = vmul.f32 %v3850_v47, %v3844_v32  ;;  %v3709_v47 = vld [vmem:[%s4906_s10 + $0x44] ss:$8 sps:$4 sm:$0xff]  }
 0x70c   :  { %3461 = vmatpush3.bf16.msra.mxu1 %v798_v44  ;;  %3462 = vmatprep.mubr.msk.bf16.mxu1 %vm4150_vm0, %v4148_v4  ;;  %v3703_v44 = vld [vmem:[%s4906_s10 + $0x24] ss:$8 sps:$4 sm:$0xff]  }
 0x70d   :  { %3472 = vmatprep.subr.bf16.mxu1 %v4148_v4  ;;  %v905_v52 = vpack.c.bf16 %v904_v49, %v904_v49  ;;  %v3712_v49 = vld [vmem:[%s4906_s10 + $0x54] ss:$8 sps:$4 sm:$0xff]  }
 0x713   :  { %3463 = vmatmul.mubr.msk.bf16.vlgmr.msra.gmra.mrb[20].mxu1 %vm546_vm3, %v792_v46  ;;  %v3704_v46 = vld [vmem:[%s4906_s10 + $0x30] ss:$8 sps:$4 sm:$0xff]  }
 0x714   :  { %3473 = vmatpush3.bf16.msra.mxu1 %v913_v48  ;;  %3474 = vmatprep.mubr.msk.bf16.mxu1 %vm4150_vm0, %v4148_v4  ;;  %v3707_v48 = vld [vmem:[%s4906_s10 + $0x40] ss:$8 sps:$4 sm:$0xff]  }
 0x71b   :  { %3475 = vmatmul.mubr.msk.bf16.vlgmr.msra.gmra.mrb[24].mxu1 %vm546_vm3, %v905_v52  ;;  %v3710_v52 = vld [vmem:[%s4906_s10 + $0x50] ss:$8 sps:$4 sm:$0xff]  }
 0x71c   :  { %1256 = vmatprep.mubr.bf16.mxu1 %v4149_v30 }
 0x7de   :  { %v716_v1 = vpop.f32.mrb[16].mxu1 }
 0x7df   :  { %v3452_v2 = vpop.f32.mrb[17].mxu1 }
 0x7e0   :  { %v719_v3 = vpop.f32.mrb[18].mxu1 }
 0x7e1   :  { %v3453_v6 = vpop.f32.mrb[19].mxu1 }
 0x7e6   :  { %v834_v8 = vpop.f32.mrb[20].mxu1 }
 0x7e7   :  { %v3464_v9 = vpop.f32.mrb[21].mxu1 }
 0x7e8   :  { %v837_v10 = vpop.f32.mrb[22].mxu1 }
 0x7e9   :  { %v3465_v11 = vpop.f32.mrb[23].mxu1 }
 0x7ee   :  { %v949_v12 = vpop.f32.mrb[24].mxu1 }
 0x7ef   :  { %v3645_v13 = vpack.i.bf16 %v949_v12, %v716_v1  ;;  %v3476_v14 = vpop.f32.mrb[25].mxu1  ;;  %v3113_v12 = vld [vmem:[#allocation10] ss:$0 sm:$0xff] }
 0x7f0   :  { %v952_v15 = vpop.f32.mrb[26].mxu1 }
 0x7f1   :  { %3646 = vrot.lane.b32.xlu1 %v3645_v13, %s4140_s8  ;;  %v3477_v17 = vpop.f32.mrb[27].mxu1 }
 0x863   :  { %v3647_v18 = vpop.permute.xlu1 %3646 }
 0x864   :  { %v3649_v19 = vunpack.i.h.bf16 %v3647_v18  ;;  %v3648_v20 = vunpack.i.l.bf16 %v3647_v18  ;;  %v3719_v18 = vld [vmem:[#allocation11 + $0x40] sm:$0xff]  }
 0x865   :  { %3314 = vmatprep.subr.bf16.mxu0 %v3719_v18 }
 0x866   :  { %v959_v21 = vsel %vm493_vm1, %v834_v8, %v3649_v19  ;;  %v726_v23 = vsel %vm493_vm1, %v4488_v62, %v3648_v20  ;;  %v3697_v62 = vld [vmem:[%s4906_s10 + $0x4] ss:$8 sps:$4 sm:$0xff]   ;;  %v3721_v20 = vld [vmem:[#allocation11 + $0x48] sm:$0xff]  }
 0x867   :  { %v976_v24 = vpack.c.bf16 %v959_v21, %v726_v23  ;;  %1224 = vmatprep.subr.bf16.mxu1 %v3697_v62  ;;  %v3112_v8 = vld [vmem:[#allocation8] ss:$0 sm:$0xff]  ;;  %v3720_v19 = vld [vmem:[#allocation11] sm:$0xff]   ;;  %v3722_v21 = vld [vmem:[#allocation11 + $0x8] sm:$0xff]  }
 0x868   :  { %1225 = vmatpush1.bf16.msra.mxu1 %v3695_v35  ;;  %v3723_v23 = vld [vmem:[#allocation11 + $0x50] sm:$0xff]   ;;  %v3734_v35 = vld [vmem:[#allocation11 + $0x38] sm:$0xff]  }
 0x869   :  { %3495 = vmatmul.mubr.bf16.vlgmr.msra.gmra.mrb[12].mxu0 %v976_v24  ;;  %1226 = vmatprep.subr.bf16.mxu1 %v3700_v36  ;;  %v3724_v24 = vld [vmem:[#allocation11 + $0x10] sm:$0xff]   ;;  %v1132_v62 = vld [vmem:[%s4907_s11] sm:$0x3] }
 0x86a   :  { %3315 = vmatpush3.bf16.msra.mxu0 %v3720_v19  ;;  %v1137_v36 = vrot.slane %v1132_v62, %v4435_v59 }
 0x86b   :  { %3316 = vmatprep.subr.bf16.mxu0 %v3721_v20 }
 0x86e   :  { %3317 = vmatpush3.bf16.msra.mxu0 %v3722_v21 }
 0x86f   :  { %3318 = vmatprep.subr.bf16.mxu0 %v3723_v23 }
 0x872   :  { %3319 = vmatpush3.bf16.msra.mxu0 %v3724_v24 }
 0x93c   :  { %v1066_v26 = vpop.f32.mrb[12].mxu0 }
 0x93d   :  { %v1067_v27 = vadd.f32 %v3103_v25, %v1066_v26  ;;  %v3496_v28 = vpop.f32.mrb[13].mxu0  ;;  %v3726_v26 = vld [vmem:[#allocation11 + $0x18] sm:$0xff]  }
 0x93e   :  { %v1069_v29 = vpop.f32.mrb[14].mxu0  ;;  %v3728_v28 = vld [vmem:[#allocation11 + $0x20] sm:$0xff]  }
 0x93f   :  { %v1070_v31 = vadd.f32 %v3103_v25, %v1069_v29  ;;  %v3497_v32 = vpop.f32.mrb[15].mxu0  ;;  %v1073_v33 = vadd.f32 %v1067_v27, %v4414_v50  ;;  %v3698_v50 = vld [vmem:[%s4906_s10 + $0x10] ss:$8 sps:$4 sm:$0xff]   ;;  %v3725_v25 = vld [vmem:[#allocation11 + $0x58] sm:$0xff]   ;;  %v3727_v27 = vld [vmem:[#allocation11 + $0x60] sm:$0xff]  }
 0x940   :  { %1227 = vmatpush1.bf16.msra.mxu1 %v3698_v50  ;;  %3320 = vmatprep.subr.bf16.mxu0 %v3725_v25  ;;  %v3729_v29 = vld [vmem:[#allocation11 + $0x68] sm:$0xff]   ;;  %v3731_v32 = vld [vmem:[#allocation11 + $0x70] sm:$0xff]   ;;  %v1141_v50 = vrot.slane %v1132_v62, %v4427_v55 }
 0x941   :  { %1077 = vadd.xlane.f32.xlu1 %v1073_v33  ;;  %v1074_v34 = vadd.f32 %v1070_v31, %v4416_v51  ;;  %1228 = vmatprep.subr.bf16.mxu1 %v3703_v44  ;;  %v3730_v31 = vld [vmem:[#allocation11 + $0x28] sm:$0xff]  }
 0x942   :  { %3321 = vmatpush3.bf16.msra.mxu0 %v3726_v26 }
 0x943   :  { %1079 = vadd.xlane.f32.xlu0 %v1074_v34  ;;  %3322 = vmatprep.subr.bf16.mxu0 %v3727_v27 }
 0x944   :  { %1229 = vmatpush1.bf16.msra.mxu1 %v3701_v16 }
 0x945   :  { %1230 = vmatprep.subr.bf16.mxu1 %v3706_v45 }
 0x946   :  { %3323 = vmatpush3.bf16.msra.mxu0 %v3728_v28 }
 0x947   :  { %3324 = vmatprep.subr.bf16.mxu0 %v3729_v29 }
 0x948   :  { %1231 = vmatpush1.bf16.msra.mxu1 %v3704_v46 }
 0x949   :  { %1232 = vmatprep.subr.bf16.mxu1 %v3709_v47 }
 0x94a   :  { %3325 = vmatpush3.bf16.msra.mxu0 %v3730_v31 }
 0x94b   :  { %3326 = vmatprep.subr.bf16.mxu0 %v3731_v32  ;;  %v3130_v32 = vld [vmem:[#allocation13] ss:$0 sm:$0xff] }
 0x94c   :  { %1233 = vmatpush1.bf16.msra.mxu1 %v3707_v48 }
 0x94d   :  { %1234 = vmatprep.subr.bf16.mxu1 %v3712_v49 }
 0x950   :  { %1235 = vmatpush1.bf16.msra.mxu1 %v3710_v52 }
 0x951   :  { %1236 = vmatprep.subr.bf16.mxu1 %v3715_v53 }
 0x954   :  { %1237 = vmatpush1.bf16.msra.mxu1 %v3713_v56 }
 0x955   :  { %1238 = vmatprep.subr.bf16.mxu1 %v3718_v58 }
 0x958   :  { %1239 = vmatpush1.bf16.msra.mxu1 %v3716_v60 }
 0x9ce   :  { %v1078_v51 = vpop.xlane.xlu1 %1077 }
 0x9cf   :  { %v1081_v37 = vmul.f32 0.0078125, %v1078_v51 }
 0x9d0   :  { %v1080_v38 = vpop.xlane.xlu0 %1079 }
 0x9d1   :  { %v1083_v39 = vsub.f32 %v1073_v33, %v1081_v37  ;;  %v1082_v40 = vmul.f32 0.0078125, %v1080_v38  ;;  %v3732_v33 = vld [vmem:[#allocation11 + $0x30] sm:$0xff]  }
 0x9d2   :  { %3327 = vmatpush3.bf16.msra.mxu0 %v3732_v33 }
 0x9d3   :  { %v1084_v42 = vsub.f32 %v1074_v34, %v1082_v40  ;;  %v1085_v5 = vmul.f32 %v1083_v39, %v1083_v39  ;;  %v3733_v34 = vld [vmem:[#allocation11 + $0x78] sm:$0xff]  }
 0x9d4   :  { %3328 = vmatprep.subr.bf16.mxu0 %v3733_v34 }
 0x9d5   :  { %1087 = vadd.xlane.f32.xlu0 %v1085_v5  ;;  %v1086_v43 = vmul.f32 %v1084_v42, %v1084_v42 }
 0x9d6   :  { %3329 = vmatpush3.bf16.msra.mxu0 %v3734_v35 }
 0x9d7   :  { %3498 = vmatprep.subr.bf16.mxu0 %v4148_v4 }
 0x9d9   :  { %1089 = vadd.xlane.f32.xlu0 %v1086_v43 }
 0xa62   :  { %v1088_v61 = vpop.xlane.xlu0 %1087 }
 0xa63   :  { %v1091_v63 = vmul.f32 0.0078125, %v1088_v61 }
 0xa65   :  { %v1093_v0 = vadd.f32 1e-05, %v1091_v63 }
 0xa66   :  { %v1090_v1 = vpop.xlane.xlu0 %1089 }
 0xa67   :  { %3851 = vrsqrt.f32 %v1093_v0  ;;  %v1092_v2 = vmul.f32 0.0078125, %v1090_v1 }
 0xa69   :  { %v1094_v3 = vadd.f32 1e-05, %v1092_v2 }
 0xa6b   :  { %3853 = vrsqrt.f32 %v1094_v3 }
 0xa71   :  { %v3852_v6 = vpop.eup %3851 }
 0xa72   :  { %v1097_v7 = vmul.f32 %v3852_v6, %v1083_v39 }
 0xa74   :  { %v1105_v11 = vmul.f32 %v3112_v8, %v1097_v7 }
 0xa75   :  { %v3854_v9 = vpop.eup %3853 }
 0xa76   :  { %v1098_v10 = vmul.f32 %v3854_v9, %v1084_v42  ;;  %v4600_v14 = vadd.f32 %v3113_v12, %v1105_v11 }
 0xa78   :  { %v1106_v13 = vmul.f32 %v3112_v8, %v1098_v10 }
 0xa7a   :  { %v4602_v15 = vadd.f32 %v3113_v12, %v1106_v13 }
 0xa7c   :  { %v1131_v17 = vpack.c.bf16 %v4602_v15, %v4600_v14 }
 0xa7e   :  { %1257 = vmatmul.mubr.bf16.vlgmr.msra.gmra.mrb[28].mxu1 %v1131_v17 }
 0xa7f   :  { %1735 = vmatprep.mubr.bf16.mxu1 %v4149_v30 }
 0xb51   :  { %v1258_v51 = vpop.f32.mrb[28].mxu1 }
 0xb52   :  { %v1259_v37 = vadd.f32 %v1258_v51, %v1137_v36  ;;  %v1260_v38 = vpop.f32.mrb[29].mxu1 }
 0xb53   :  { %v1261_v39 = vadd.f32 %v1260_v38, %v1141_v50  ;;  %v1262_v40 = vpop.f32.mrb[30].mxu1 }
 0xb54   :  { %v1267_v42 = vmul.f32 %v1259_v37, %v1259_v37  ;;  %v1263_v5 = vadd.f32 %v1262_v40, %v1137_v36  ;;  %v1264_v43 = vpop.f32.mrb[31].mxu1  ;;  %v3737_v40 = vld [vmem:[#allocation5 + $0xc4] ss:$12 sps:$4 sm:$0xff]  }
 0xb55   :  { %v1268_v44 = vmul.f32 %v1261_v39, %v1261_v39  ;;  %v1265_v16 = vadd.f32 %v1264_v43, %v1141_v50  ;;  %1703 = vmatprep.subr.bf16.mxu1 %v3737_v40  ;;  %v3742_v43 = vld [vmem:[#allocation5 + $0xe0] ss:$12 sps:$4 sm:$0xff]  }
 0xb56   :  { %v1271_v45 = vmul.f32 %v1267_v42, %v1259_v37  ;;  %v1269_v46 = vmul.f32 %v1263_v5, %v1263_v5  ;;  %v3738_v42 = vld [vmem:[#allocation5 + $0xc8] ss:$12 sps:$4 sm:$0xff]  }
 0xb57   :  { %v1272_v47 = vmul.f32 %v1268_v44, %v1261_v39  ;;  %v1270_v48 = vmul.f32 %v1265_v16, %v1265_v16  ;;  %v3739_v44 = vld [vmem:[#allocation5 + $0xd8] ss:$12 sps:$4 sm:$0xff]  }
 0xb58   :  { %v1275_v49 = vmul.f32 0.044715, %v1271_v45  ;;  %v1273_v52 = vmul.f32 %v1269_v46, %v1263_v5 }
 0xb59   :  { %v1276_v53 = vmul.f32 0.044715, %v1272_v47  ;;  %v1274_v56 = vmul.f32 %v1270_v48, %v1265_v16 }
 0xb5a   :  { %v1279_v58 = vadd.f32 %v1275_v49, %v1259_v37  ;;  %v1277_v60 = vmul.f32 0.044715, %v1273_v52  ;;  %v3745_v52 = vld [vmem:[#allocation5 + $0xf4] ss:$12 sps:$4 sm:$0xff]  }
 0xb5b   :  { %v1280_v61 = vadd.f32 %v1276_v53, %v1261_v39  ;;  %v1278_v63 = vmul.f32 0.044715, %v1274_v56  ;;  %v3743_v53 = vld [vmem:[#allocation5 + $0xf0] ss:$12 sps:$4 sm:$0xff]   ;;  %v3746_v56 = vld [vmem:[#allocation5 + $0xf8] ss:$12 sps:$4 sm:$0xff]  }
 0xb5c   :  { %v1283_v0 = vmul.f32 0.7978846, %v1279_v58  ;;  %v1281_v1 = vadd.f32 %v1277_v60, %v1263_v5  ;;  %v3749_v58 = vld [vmem:[#allocation5 + $0x10c] ss:$12 sps:$4 sm:$0xff]   ;;  %v3747_v60 = vld [vmem:[#allocation5 + $0x108] ss:$12 sps:$4 sm:$0xff]  }
 0xb5d   :  { %v1284_v2 = vmul.f32 0.7978846, %v1280_v61  ;;  %v1282_v3 = vadd.f32 %v1278_v63, %v1265_v16  ;;  %v3750_v61 = vld [vmem:[#allocation5 + $0x110] ss:$12 sps:$4 sm:$0xff]  }
 0xb5e   :  { %3855 = vtanh.f32 %v1283_v0  ;;  %v1285_v6 = vmul.f32 0.7978846, %v1281_v1  ;;  %v3753_v63 = vld [vmem:[#allocation5 + $0x124] ss:$12 sps:$4 sm:$0xff]   ;;  %v3751_v0 = vld [vmem:[#allocation5 + $0x120] ss:$12 sps:$4 sm:$0xff]  }
 0xb5f   :  { %3857 = vtanh.f32 %v1284_v2  ;;  %v1286_v7 = vmul.f32 0.7978846, %v1282_v3  ;;  %v3754_v1 = vld [vmem:[#allocation5 + $0x128] ss:$12 sps:$4 sm:$0xff]   ;;  %v3755_v3 = vld [vmem:[#allocation5 + $0x138] ss:$12 sps:$4 sm:$0xff]  }
 0xb60   :  { %3859 = vtanh.f32 %v1285_v6  ;;  %v3757_v2 = vld [vmem:[#allocation5 + $0x13c] ss:$12 sps:$4 sm:$0xff]   ;;  %v3758_v6 = vld [vmem:[#allocation5 + $0x140] ss:$12 sps:$4 sm:$0xff]  }
 0xb61   :  { %3861 = vtanh.f32 %v1286_v7  ;;  %v3761_v7 = vld [vmem:[#allocation5 + $0x154] ss:$12 sps:$4 sm:$0xff]  }
 0xb68   :  { %v3856_v8 = vpop.eup %3855 }
 0xb69   :  { %v3858_v9 = vpop.eup %3857  ;;  %v1291_v10 = vadd.f32 1.0, %v3856_v8  ;;  %v3759_v8 = vld [vmem:[#allocation5 + $0x150] ss:$12 sps:$4 sm:$0xff]  }
 0xb6a   :  { %v3860_v11 = vpop.eup %3859  ;;  %v1292_v12 = vadd.f32 1.0, %v3858_v9  ;;  %v3762_v9 = vld [vmem:[#allocation5 + $0x158] ss:$12 sps:$4 sm:$0xff]  }
 0xb6b   :  { %v3862_v13 = vpop.eup %3861  ;;  %v1295_v17 = vmul.f32 0.5, %v1291_v10  ;;  %v1293_v18 = vadd.f32 1.0, %v3860_v11  ;;  %v3765_v10 = vld [vmem:[#allocation5 + $0x16c] ss:$12 sps:$4 sm:$0xff]   ;;  %v3763_v11 = vld [vmem:[#allocation5 + $0x168] ss:$12 sps:$4 sm:$0xff]  }
 0xb6c   :  { %v1294_v19 = vadd.f32 1.0, %v3862_v13  ;;  %v1296_v20 = vmul.f32 0.5, %v1292_v12  ;;  %v3766_v12 = vld [vmem:[#allocation5 + $0x170] ss:$12 sps:$4 sm:$0xff]  }
 0xb6d   :  { %v1297_v21 = vmul.f32 0.5, %v1293_v18  ;;  %v1299_v24 = vmul.f32 %v1295_v17, %v1259_v37 }
 0xb6e   :  { %v1298_v23 = vmul.f32 0.5, %v1294_v19  ;;  %v1300_v26 = vmul.f32 %v1296_v20, %v1261_v39  ;;  %v3735_v39 = vld [vmem:[#allocation5 + $0xc0] ss:$12 sps:$4 sm:$0xff]  }
 0xb6f   :  { %v1301_v25 = vmul.f32 %v1297_v21, %v1263_v5  ;;  %v3741_v5 = vld [vmem:[#allocation5 + $0xdc] ss:$12 sps:$4 sm:$0xff]   ;;  %1704 = vmatpush1.bf16.msra.mxu1 %v3735_v39 }
 0xb70   :  { %v1302_v27 = vmul.f32 %v1298_v23, %v1265_v16  ;;  %1705 = vmatprep.subr.bf16.mxu1 %v3741_v5 }
 0xb71   :  { %v1335_v28 = vpack.c.bf16 %v1301_v25, %v1299_v24  ;;  %v3147_v24 = vld [vmem:[%s4910_s14] ss:$0 sm:$0xff] }
 0xb72   :  { %v1336_v29 = vpack.c.bf16 %v1302_v27, %v1300_v26 }
 0xb73   :  { %1706 = vmatpush1.bf16.msra.mxu1 %v3739_v44 }
 0xb74   :  { %1472 = vmatprep.mubr.bf16.mxu0 %v1336_v29  ;;  %1707 = vmatprep.subr.bf16.mxu1 %v3745_v52  ;;  %v3148_v29 = vld [vmem:[#allocation14] ss:$0 sm:$0xff] }
 0xb75   :  { %1473 = vmatmul.mubr.bf16.vlgmr.msra.gmra.mrb[16].mxu0 %v1335_v28 }
 0xb76   :  { %3514 = vmatprep.mubr.msk.bf16.mxu0 %vm4150_vm0, %v4148_v4  ;;  %3499 = vmatpush3.bf16.msra.mxu0 %v3738_v42 }
 0xb77   :  { %3500 = vmatprep.subr.bf16.mxu0 %v4148_v4  ;;  %1708 = vmatpush1.bf16.msra.mxu1 %v3743_v53 }
 0xb78   :  { %1709 = vmatprep.subr.bf16.mxu1 %v3749_v58 }
 0xb7a   :  { %3501 = vmatpush3.bf16.msra.mxu0 %v3742_v43 }
 0xb7b   :  { %3502 = vmatprep.subr.bf16.mxu0 %v4148_v4  ;;  %1710 = vmatpush1.bf16.msra.mxu1 %v3747_v60 }
 0xb7c   :  { %1711 = vmatprep.subr.bf16.mxu1 %v3753_v63 }
 0xb7e   :  { %3503 = vmatpush3.bf16.msra.mxu0 %v3746_v56 }
 0xb7f   :  { %3504 = vmatprep.subr.bf16.mxu0 %v4148_v4  ;;  %1712 = vmatpush1.bf16.msra.mxu1 %v3751_v0 }
 0xb80   :  { %1713 = vmatprep.subr.bf16.mxu1 %v3757_v2 }
 0xb82   :  { %3505 = vmatpush3.bf16.msra.mxu0 %v3750_v61 }
 0xb83   :  { %3506 = vmatprep.subr.bf16.mxu0 %v4148_v4  ;;  %1714 = vmatpush1.bf16.msra.mxu1 %v3755_v3 }
 0xb84   :  { %1715 = vmatprep.subr.bf16.mxu1 %v3761_v7 }
 0xb86   :  { %3507 = vmatpush3.bf16.msra.mxu0 %v3754_v1 }
 0xb87   :  { %3508 = vmatprep.subr.bf16.mxu0 %v4148_v4  ;;  %1716 = vmatpush1.bf16.msra.mxu1 %v3759_v8 }
 0xb88   :  { %1717 = vmatprep.subr.bf16.mxu1 %v3765_v10 }
 0xb8a   :  { %3509 = vmatpush3.bf16.msra.mxu0 %v3758_v6 }
 0xb8b   :  { %3510 = vmatprep.subr.bf16.mxu0 %v4148_v4  ;;  %1718 = vmatpush1.bf16.msra.mxu1 %v3763_v11 }
 0xb8c   :  { %3518 = vmatprep.subr.bf16.mxu1 %v4148_v4 }
 0xb8e   :  { %3511 = vmatpush3.bf16.msra.mxu0 %v3762_v9 }
 0xb8f   :  { %3512 = vmatprep.subr.bf16.mxu0 %v4148_v4 }
 0xb92   :  { %3513 = vmatpush3.bf16.msra.mxu0 %v3766_v12 }
 0xb93   :  { %3542 = vmatprep.subr.bf16.mxu0 %v4148_v4 }
 0xc48   :  { %v3330_v31 = vpop.f32.mrb[16].mxu0 }
 0xc49   :  { %v3331_v33 = vpop.f32.mrb[17].mxu0 }
 0xc4a   :  { %v3332_v34 = vadd.f32 %v3331_v33, %v3330_v31  ;;  %v3333_v35 = vpop.f32.mrb[18].mxu0 }
 0xc4b   :  { %v3334_v62 = vpop.f32.mrb[19].mxu0 }
 0xc4c   :  { %v1475_v36 = vadd.f32 %v3332_v34, %v3130_v32  ;;  %v3335_v50 = vadd.f32 %v3334_v62, %v3333_v35  ;;  %v3149_v35 = vld [vmem:[%s4901_s5 + $0x3] sm:$0x7] }
 0xc4d   :  { %v1567_v62 = vrot.slane %v3149_v35, %v4427_v55 }
 0xc4e   :  { %v1478_v51 = vadd.f32 %v3335_v50, %v3130_v32  ;;  %v1481_v37 = vadd.f32 %v1475_v36, %v4600_v14 }
 0xc50   :  { %1485 = vadd.xlane.f32.xlu1 %v1481_v37  ;;  %v1482_v38 = vadd.f32 %v1478_v51, %v4602_v15  ;;  %v1571_v51 = vrot.slane %v3149_v35, %v274_v57 }
 0xc52   :  { %1487 = vadd.xlane.f32.xlu0 %v1482_v38 }
 0xcdd   :  { %v1486_v14 = vpop.xlane.xlu1 %1485 }
 0xcde   :  { %v1489_v16 = vmul.f32 0.0078125, %v1486_v14  ;;  %v1563_v14 = vrot.slane %v3149_v35, %v4435_v59 }
 0xcdf   :  { %v1488_v15 = vpop.xlane.xlu0 %1487 }
 0xce0   :  { %v1491_v45 = vsub.f32 %v1481_v37, %v1489_v16  ;;  %v1490_v46 = vmul.f32 0.0078125, %v1488_v15 }
 0xce2   :  { %v1492_v47 = vsub.f32 %v1482_v38, %v1490_v46  ;;  %v1493_v48 = vmul.f32 %v1491_v45, %v1491_v45 }
 0xce4   :  { %1495 = vadd.xlane.f32.xlu1 %v1493_v48  ;;  %v1494_v49 = vmul.f32 %v1492_v47, %v1492_v47 }
 0xce6   :  { %1497 = vadd.xlane.f32.xlu0 %v1494_v49 }
 0xd71   :  { %v1496_v13 = vpop.xlane.xlu1 %1495 }
 0xd72   :  { %v1499_v17 = vmul.f32 0.0078125, %v1496_v13 }
 0xd73   :  { %v1498_v18 = vpop.xlane.xlu0 %1497 }
 0xd74   :  { %v1501_v19 = vadd.f32 1e-05, %v1499_v17  ;;  %v1500_v20 = vmul.f32 0.0078125, %v1498_v18 }
 0xd76   :  { %3863 = vrsqrt.f32 %v1501_v19  ;;  %v1502_v21 = vadd.f32 1e-05, %v1500_v20 }
 0xd78   :  { %3865 = vrsqrt.f32 %v1502_v21 }
 0xd80   :  { %v3864_v23 = vpop.eup %3863 }
 0xd81   :  { %v1505_v25 = vmul.f32 %v3864_v23, %v1491_v45 }
 0xd82   :  { %v3866_v26 = vpop.eup %3865 }
 0xd83   :  { %v1506_v27 = vmul.f32 %v3866_v26, %v1492_v47  ;;  %v1513_v28 = vmul.f32 %v3147_v24, %v1505_v25 }
 0xd85   :  { %v1514_v31 = vmul.f32 %v3147_v24, %v1506_v27  ;;  %v4629_v32 = vadd.f32 %v3148_v29, %v1513_v28 }
 0xd87   :  { %v4631_v33 = vadd.f32 %v3148_v29, %v1514_v31 }
 0xd89   :  { %v1556_v34 = vpack.c.bf16 %v4631_v33, %v4629_v32 }
 0xd8b   :  { %1736 = vmatmul.mubr.bf16.vlgmr.msra.gmra.mrb[32].mxu1 %v1556_v34  ;;  %3515 = vmatmul.mubr.bf16.vlgmr.msra.gmra.mrb[20].mxu0 %v1556_v34 }
 0xd8c   :  { %3520 = vmatprep.mubr.msk.bf16.mxu1 %vm4150_vm0, %v4148_v4  ;;  %3544 = vmatprep.mubr.msk.bf16.mxu0 %vm4150_vm0, %v4148_v4 }
 0xe5e   :  { %v1737_v36 = vpop.f32.mrb[32].mxu1  ;;  %v1780_v50 = vpop.f32.mrb[20].mxu0 }
 0xe5f   :  { %v1739_v37 = vpop.f32.mrb[33].mxu1  ;;  %v3516_v38 = vpop.f32.mrb[21].mxu0  ;;  %v1781_v45 = vadd.f32 %v1780_v50, %v1571_v51  ;;  %v1738_v54 = vadd.f32 %v1737_v36, %v1563_v14 }
 0xe60   :  { %v1740_v39 = vadd.f32 %v1739_v37, %v1567_v62  ;;  %v1741_v40 = vpop.f32.mrb[34].mxu1  ;;  %v1783_v42 = vpop.f32.mrb[22].mxu0 }
 0xe61   :  { %v4645_v5 = vadd.f32 %v1783_v42, %v1571_v51  ;;  %v1743_v43 = vpop.f32.mrb[35].mxu1  ;;  %v3517_v44 = vpop.f32.mrb[23].mxu0  ;;  %v4651_v48 = vpack.c.bf16 %v1781_v45, %v1781_v45  ;;  %v1742_v49 = vadd.f32 %v1741_v40, %v1563_v14  ;;  %v1787_v52 = vpack.c.bf16 %v1738_v54, %v1738_v54 }
 0xe62   :  { %v1788_v16 = vpack.c.bf16 %v1740_v39, %v1740_v39  ;;  %v1744_v15 = vadd.f32 %v1743_v43, %v1567_v62 }
 0xe63   :  { %v1854_v53 = vsel %vm563_vm2, %v4651_v48, 0  ;;  %v2016_v56 = vpack.c.bf16 %v1742_v49, %v1742_v49 }
 0xe64   :  { %v1793_v46 = vsel %vm493_vm1, %v1788_v16, 0  ;;  %v2017_v47 = vpack.c.bf16 %v1744_v15, %v1744_v15 }
 0xe65   :  { %3519 = vmatpush3.bf16.xpose.msra.mxu1 %v1793_v46 }
 0xe66   :  { %v2022_v57 = vsel %vm493_vm1, %v2017_v47, 0  ;;  %3524 = vmatprep.subr.bf16.mxu1 %v4148_v4 }
 0xe67   :  { %3543 = vmatpush3.bf16.xpose.msra.mxu0 %v2022_v57 }
 0xe68   :  { %3554 = vmatprep.subr.bf16.mxu0 %v4148_v4 }
 0xe6c   :  { %3521 = vmatmul.mubr.msk.bf16.vlgmr.msra.gmra.mrb[36].mxu1 %vm493_vm1, %v1787_v52 }
 0xe6d   :  { %3525 = vmatpush3.bf16.msra.mxu1 %v1854_v53  ;;  %3526 = vmatprep.mubr.msk.bf16.mxu1 %vm4150_vm0, %v4148_v4 }
 0xe6e   :  { %3545 = vmatmul.mubr.msk.bf16.vlgmr.msra.gmra.mrb[24].mxu0 %vm493_vm1, %v2016_v56  ;;  %3530 = vmatprep.subr.bf16.mxu1 %v4148_v4 }
 0xe6f   :  { %3556 = vmatprep.mubr.msk.bf16.mxu0 %vm4150_vm0, %v4148_v4 }
 0xf3f   :  { %v1829_v58 = vpop.f32.mrb[36].mxu1 }
 0xf40   :  { %v1835_v60 = vmul.f32 0.125, %v1829_v58  ;;  %v3522_v61 = vpop.f32.mrb[37].mxu1 }
 0xf41   :  { %v1832_v63 = vpop.f32.mrb[38].mxu1  ;;  %v2058_v0 = vpop.f32.mrb[24].mxu0 }
 0xf42   :  { %v3523_v1 = vpop.f32.mrb[39].mxu1  ;;  %v3546_v2 = vpop.f32.mrb[25].mxu0  ;;  %v1836_v3 = vadd.f32 %v1835_v60, %v4461_v22  ;;  %v2064_v21 = vmul.f32 0.125, %v2058_v0 }
 0xf43   :  { %v2061_v6 = vpop.f32.mrb[26].mxu0 }
 0xf44   :  { %v3547_v7 = vpop.f32.mrb[27].mxu0  ;;  %v1837_v8 = vsel %vm546_vm3, %v1836_v3, -inf  ;;  %v2065_v23 = vadd.f32 %v2064_v21, %v4471_v41  ;;  %v2078_v6 = vpack.c.bf16 %v4645_v5, %v4645_v5 }
 0xf45   :  { %1838 = vmax.xlane.f32.xlu1 %v1837_v8 }
 0xf46   :  { %v2066_v24 = vsel %vm546_vm3, %v2065_v23, -inf }
 0xf56   :  { %1900 = vrot.lane.b32.xlu1 %v1788_v16, %s4140_s8 }
 0xf5a   :  { %2129 = vrot.lane.b32.xlu1 %v2017_v47, %s4140_s8 }
 0xf5e   :  { %2126 = vrot.lane.b32.xlu1 %v2016_v56, %s4140_s8 }
 0xfd2   :  { %v1839_v9 = vpop.xlane.xlu1 %1838 }
 0xfd3   :  { %v1840_v10 = vsub.f32 %v1836_v3, %v1839_v9 }
 0xfd5   :  { %v1841_v11 = vmul.f32 1.442695, %v1840_v10 }
 0xfd6   :  { %v1901_v12 = vpop.permute.xlu1 %1900 }
 0xfd7   :  { %3867 = vpow2.f32 %v1841_v11  ;;  %v1906_v29 = vsel %vm493_vm1, %v1901_v12, 0 }
 0xfda   :  { %v2130_v13 = vpop.permute.xlu1 %2129 }
 0xfdb   :  { %v2135_v17 = vsel %vm493_vm1, %v2130_v13, 0  ;;  %v2083_v13 = vsel %vm563_vm2, %v2078_v6, 0 }
 0xfdc   :  { %3555 = vmatpush3.bf16.xpose.msra.mxu0 %v2135_v17 }
 0xfdd   :  { %3566 = vmatprep.subr.bf16.mxu0 %v4148_v4 }
 0xfde   :  { %v2127_v19 = vpop.permute.xlu1 %2126 }
 0xfe1   :  { %v3868_v18 = vpop.eup %3867 }
 0xfe2   :  { %v1843_v20 = vsel %vm546_vm3, %v3868_v18, 0.0 }
 0xfe3   :  { %1844 = vadd.xlane.f32.xlu0 %v1843_v20  ;;  %3557 = vmatmul.mubr.msk.bf16.vlgmr.msra.gmra.mrb[28].mxu0 %vm493_vm1, %v2127_v19 }
 0xfe4   :  { %3582 = vmatprep.mubr.msk.bf16.mxu0 %vm4150_vm0, %v4148_v4 }
 0xff9   :  { %1897 = vrot.lane.b32.xlu0 %v1787_v52, %s4140_s8 }
0x1018   :  { %2067 = vmax.xlane.f32.xlu0 %v2066_v24  ;;  %v3767_v24 = vld [vmem:[%s4902_s6 + $0x40] sm:$0xff]  }
0x1019   :  { %3567 = vmatpush3.bf16.msra.mxu0 %v3767_v24 }
0x101a   :  { %3568 = vmatprep.subr.bf16.mxu0 %v4148_v4 }
0x1070   :  { %v1845_v25 = vpop.xlane.xlu0 %1844 }
0x1071   :  { %3869 = vrcp.f32 %v1845_v25  ;;  %v3768_v25 = vld [vmem:[%s4902_s6 + $0x48] sm:$0xff]  }
0x1072   :  { %3569 = vmatpush3.bf16.msra.mxu0 %v3768_v25 }
0x1073   :  { %3570 = vmatprep.subr.bf16.mxu0 %v4148_v4 }
0x1074   :  { %v1898_v31 = vpop.permute.xlu0 %1897 }
0x107b   :  { %v3870_v26 = vpop.eup %3869 }
0x107c   :  { %v1847_v27 = vmul.f32 %v3870_v26, %v3868_v18  ;;  %v3769_v26 = vld [vmem:[%s4902_s6 + $0x50] sm:$0xff]  }
0x107d   :  { %3571 = vmatpush3.bf16.msra.mxu0 %v3769_v26 }
0x107e   :  { %v1848_v28 = vpack.c.bf16 %v1847_v27, %v1847_v27  ;;  %3572 = vmatprep.subr.bf16.mxu0 %v4148_v4  ;;  %v3771_v27 = vld [vmem:[%s4902_s6 + $0x60] sm:$0xff]  }
0x1080   :  { %3527 = vmatmul.mubr.msk.bf16.vlgmr.msra.gmra.mrb[40].mxu1 %vm546_vm3, %v1848_v28  ;;  %v3772_v28 = vld [vmem:[%s4902_s6 + $0x68] sm:$0xff]  }
0x1081   :  { %3531 = vmatpush3.bf16.xpose.msra.mxu1 %v1906_v29  ;;  %3532 = vmatprep.mubr.msk.bf16.mxu1 %vm4150_vm0, %v4148_v4  ;;  %v3773_v29 = vld [vmem:[%s4902_s6 + $0x70] sm:$0xff]  }
0x1082   :  { %3536 = vmatprep.subr.bf16.mxu1 %v4148_v4 }
0x1088   :  { %3533 = vmatmul.mubr.msk.bf16.vlgmr.msra.gmra.mrb[44].mxu1 %vm493_vm1, %v1898_v31 }
0x1089   :  { %3538 = vmatprep.mubr.msk.bf16.mxu1 %vm4150_vm0, %v4148_v4 }
0x10a5   :  { %v2068_v38 = vpop.xlane.xlu0 %2067 }
0x10a6   :  { %v2069_v39 = vsub.f32 %v2065_v23, %v2068_v38 }
0x10a8   :  { %v2070_v40 = vmul.f32 1.442695, %v2069_v39 }
0x10aa   :  { %3871 = vpow2.f32 %v2070_v40 }
0x10b4   :  { %v3872_v57 = vpop.eup %3871 }
0x10b5   :  { %v2072_v49 = vsel %vm546_vm3, %v3872_v57, 0.0 }
0x10b6   :  { %v2171_v34 = vpop.f32.mrb[28].mxu0 }
0x10b7   :  { %v2177_v35 = vmul.f32 0.125, %v2171_v34  ;;  %v3558_v62 = vpop.f32.mrb[29].mxu0 }
0x10b8   :  { %v2174_v36 = vpop.f32.mrb[30].mxu0 }
0x10b9   :  { %v3559_v50 = vpop.f32.mrb[31].mxu0  ;;  %v2178_v51 = vadd.f32 %v2177_v35, %v4471_v41  ;;  %v3774_v36 = vld [vmem:[%s4902_s6 + $0x78] sm:$0xff]  }
0x10bb   :  { %v2179_v37 = vsel %vm546_vm3, %v2178_v51, -inf }
0x10bc   :  { %2180 = vmax.xlane.f32.xlu0 %v2179_v37 }
0x1149   :  { %v2181_v52 = vpop.xlane.xlu0 %2180 }
0x114a   :  { %v2182_v53 = vsub.f32 %v2178_v51, %v2181_v52 }
0x114c   :  { %v2183_v60 = vmul.f32 1.442695, %v2182_v53 }
0x1153   :  { %v4687_v42 = vpop.f32.mrb[40].mxu1 }
0x1154   :  { %v3528_v43 = vpop.f32.mrb[41].mxu1 }
0x1155   :  { %v1893_v44 = vpop.f32.mrb[42].mxu1 }
0x1156   :  { %v3529_v14 = vpop.f32.mrb[43].mxu1 }
0x115b   :  { %v1942_v16 = vpop.f32.mrb[44].mxu1 }
0x115c   :  { %v1948_v15 = vmul.f32 0.125, %v1942_v16  ;;  %v3534_v45 = vpop.f32.mrb[45].mxu1 }
0x115d   :  { %v1945_v46 = vpop.f32.mrb[46].mxu1 }
0x115e   :  { %v3535_v47 = vpop.f32.mrb[47].mxu1  ;;  %v1949_v54 = vadd.f32 %v1948_v15, %v4461_v22 }
0x1160   :  { %v1950_v41 = vsel %vm546_vm3, %v1949_v54, -inf }
0x1161   :  { %1951 = vmax.xlane.f32.xlu1 %v1950_v41  ;;  %v3198_v41 = vld [vmem:[#allocation7 + $0x1] ss:$0 sm:$0xff] }
0x1165   :  { %2073 = vadd.xlane.f32.xlu1 %v2072_v49 }
0x1176   :  { %1963 = vrot.lane.b32.xlu1 %v4651_v48, %s4140_s8 }
0x11ee   :  { %v1952_v56 = vpop.xlane.xlu1 %1951 }
0x11ef   :  { %v1953_v58 = vsub.f32 %v1949_v54, %v1952_v56 }
0x11f1   :  { %v1954_v61 = vmul.f32 1.442695, %v1953_v58 }
0x11f2   :  { %v2074_v63 = vpop.xlane.xlu1 %2073 }
0x11f3   :  { %3873 = vpow2.f32 %v1954_v61 }
0x11f4   :  { %3875 = vpow2.f32 %v2183_v60 }
0x11f6   :  { %v1964_v22 = vpop.permute.xlu1 %1963 }
0x11f7   :  { %v1969_v0 = vsel %vm563_vm2, %v1964_v22, 0  ;;  %v3780_v22 = vld [vmem:[%s4906_s10 + $0x94] ss:$8 sps:$4 sm:$0xff]  }
0x11f8   :  { %3537 = vmatpush3.bf16.msra.mxu1 %v1969_v0 }
0x11f9   :  { %3548 = vmatprep.subr.bf16.mxu1 %v4148_v4 }
0x11fd   :  { %v3874_v1 = vpop.eup %3873 }
0x11fe   :  { %v1956_v2 = vsel %vm546_vm3, %v3874_v1, 0.0  ;;  %v3876_v3 = vpop.eup %3875 }
0x11ff   :  { %1957 = vadd.xlane.f32.xlu0 %v1956_v2  ;;  %v2185_v48 = vsel %vm546_vm3, %v3876_v3, 0.0 }
0x1203   :  { %2186 = vadd.xlane.f32.xlu0 %v2185_v48 }
0x1219   :  { %2192 = vrot.lane.b32.xlu0 %v2078_v6, %s4140_s8 }
0x128c   :  { %v1958_v7 = vpop.xlane.xlu0 %1957 }
0x128d   :  { %3877 = vrcp.f32 %v1958_v7 }
0x128e   :  { %3879 = vrcp.f32 %v2074_v63  ;;  %v3775_v63 = vld [vmem:[%s4906_s10 + $0x80] ss:$8 sps:$4 sm:$0xff]  }
0x1290   :  { %v2187_v8 = vpop.xlane.xlu0 %2186 }
0x1291   :  { %3881 = vrcp.f32 %v2187_v8  ;;  %v3783_v8 = vld [vmem:[%s4906_s10 + $0xa4] ss:$8 sps:$4 sm:$0xff]  }
0x1294   :  { %v2193_v17 = vpop.permute.xlu0 %2192 }
0x1295   :  { %v2198_v20 = vsel %vm563_vm2, %v2193_v17, 0  ;;  %v3790_v17 = vld [vmem:[%s4906_s10 + $0xd0] ss:$8 sps:$4 sm:$0xff]  }
0x1297   :  { %v3878_v9 = vpop.eup %3877 }
0x1298   :  { %v1960_v10 = vmul.f32 %v3878_v9, %v3874_v1  ;;  %v3880_v12 = vpop.eup %3879  ;;  %v3781_v9 = vld [vmem:[%s4906_s10 + $0xa0] ss:$8 sps:$4 sm:$0xff]  }
0x1299   :  { %v2076_v5 = vmul.f32 %v3880_v12, %v3872_v57  ;;  %v3789_v12 = vld [vmem:[%s4906_s10 + $0xc4] ss:$8 sps:$4 sm:$0xff]  }
0x129a   :  { %v1961_v11 = vpack.c.bf16 %v1960_v10, %v1960_v10  ;;  %v3786_v10 = vld [vmem:[%s4906_s10 + $0xb4] ss:$8 sps:$4 sm:$0xff]  }
0x129b   :  { %v2077_v18 = vpack.c.bf16 %v2076_v5, %v2076_v5  ;;  %v3882_v19 = vpop.eup %3881  ;;  %v3792_v5 = vld [vmem:[%s4906_s10 + $0xd4] ss:$8 sps:$4 sm:$0xff]  }
0x129c   :  { %3539 = vmatmul.mubr.msk.bf16.vlgmr.msra.gmra.mrb[48].mxu1 %vm546_vm3, %v1961_v11  ;;  %v2189_v21 = vmul.f32 %v3882_v19, %v3876_v3  ;;  %v3784_v11 = vld [vmem:[%s4906_s10 + $0xb0] ss:$8 sps:$4 sm:$0xff]   ;;  %v3793_v19 = vld [vmem:[%s4906_s10 + $0xe0] ss:$8 sps:$4 sm:$0xff]  }
0x129d   :  { %3549 = vmatpush3.bf16.msra.mxu1 %v2083_v13  ;;  %3550 = vmatprep.mubr.msk.bf16.mxu1 %vm4150_vm0, %v4148_v4  ;;  %v3787_v13 = vld [vmem:[%s4906_s10 + $0xc0] ss:$8 sps:$4 sm:$0xff]  }
0x129e   :  { %3560 = vmatprep.subr.bf16.mxu1 %v4148_v4  ;;  %v2190_v23 = vpack.c.bf16 %v2189_v21, %v2189_v21  ;;  %v3796_v21 = vld [vmem:[%s4906_s10 + $0xf0] ss:$8 sps:$4 sm:$0xff]  }
0x12a4   :  { %3551 = vmatmul.mubr.msk.bf16.vlgmr.msra.gmra.mrb[52].mxu1 %vm546_vm3, %v2077_v18  ;;  %v3795_v18 = vld [vmem:[%s4906_s10 + $0xe4] ss:$8 sps:$4 sm:$0xff]  }
0x12a5   :  { %3561 = vmatpush3.bf16.msra.mxu1 %v2198_v20  ;;  %3562 = vmatprep.mubr.msk.bf16.mxu1 %vm4150_vm0, %v4148_v4  ;;  %v3798_v20 = vld [vmem:[%s4906_s10 + $0xf4] ss:$8 sps:$4 sm:$0xff]  }
0x12ac   :  { %3563 = vmatmul.mubr.msk.bf16.vlgmr.msra.gmra.mrb[56].mxu1 %vm546_vm3, %v2190_v23 }
0x12ad   :  { %2547 = vmatprep.mubr.bf16.mxu1 %v4149_v30  ;;  %v3770_v30 = vld [vmem:[%s4902_s6 + $0x58] sm:$0xff]  }
0x12ae   :  { %3573 = vmatpush3.bf16.msra.mxu0 %v3770_v30 }
0x12af   :  { %3574 = vmatprep.subr.bf16.mxu0 %v4148_v4 }
0x12b2   :  { %3575 = vmatpush3.bf16.msra.mxu0 %v3771_v27 }
0x12b3   :  { %3576 = vmatprep.subr.bf16.mxu0 %v4148_v4 }
0x12b6   :  { %3577 = vmatpush3.bf16.msra.mxu0 %v3772_v28 }
0x12b7   :  { %3578 = vmatprep.subr.bf16.mxu0 %v4148_v4 }
0x12ba   :  { %3579 = vmatpush3.bf16.msra.mxu0 %v3773_v29  ;;  %v3207_v29 = vld [vmem:[#allocation8 + $0x1] ss:$0 sm:$0xff] }
0x12bb   :  { %3580 = vmatprep.subr.bf16.mxu0 %v4148_v4 }
0x12be   :  { %3581 = vmatpush3.bf16.msra.mxu0 %v3774_v36  ;;  %v3208_v36 = vld [vmem:[#allocation10 + $0x1] ss:$0 sm:$0xff] }
0x136f   :  { %v2005_v31 = vpop.f32.mrb[48].mxu1 }
0x1370   :  { %v3540_v34 = vpop.f32.mrb[49].mxu1 }
0x1371   :  { %v2008_v35 = vpop.f32.mrb[50].mxu1 }
0x1372   :  { %v3541_v62 = vpop.f32.mrb[51].mxu1 }
0x1377   :  { %v2119_v50 = vpop.f32.mrb[52].mxu1 }
0x1378   :  { %v3552_v51 = vpop.f32.mrb[53].mxu1 }
0x1379   :  { %v2122_v37 = vpop.f32.mrb[54].mxu1 }
0x137a   :  { %v3553_v38 = vpop.f32.mrb[55].mxu1 }
0x137f   :  { %v2234_v39 = vpop.f32.mrb[56].mxu1 }
0x1380   :  { %v3650_v40 = vpack.i.bf16 %v2234_v39, %v2005_v31  ;;  %v3564_v43 = vpop.f32.mrb[57].mxu1  ;;  %v3799_v39 = vld [vmem:[#allocation11 + $0xc0] sm:$0xff]  }
0x1381   :  { %v2237_v44 = vpop.f32.mrb[58].mxu1  ;;  %3370 = vmatprep.subr.bf16.mxu0 %v3799_v39  ;;  %v3801_v43 = vld [vmem:[#allocation11 + $0xc8] sm:$0xff]  }
0x1382   :  { %3651 = vrot.lane.b32.xlu1 %v3650_v40, %s4140_s8  ;;  %v3565_v14 = vpop.f32.mrb[59].mxu1  ;;  %v3800_v40 = vld [vmem:[#allocation11 + $0x80] sm:$0xff]   ;;  %v3802_v44 = vld [vmem:[#allocation11 + $0x88] sm:$0xff]  }
0x1383   :  { %v3803_v14 = vld [vmem:[#allocation11 + $0xd0] sm:$0xff]  }
0x13f4   :  { %v3652_v16 = vpop.permute.xlu1 %3651 }
0x13f5   :  { %v3654_v15 = vunpack.i.h.bf16 %v3652_v16  ;;  %v3653_v45 = vunpack.i.l.bf16 %v3652_v16  ;;  %v3804_v16 = vld [vmem:[#allocation11 + $0x90] sm:$0xff]  }
0x13f7   :  { %v2244_v46 = vsel %vm493_vm1, %v2119_v50, %v3654_v15  ;;  %v2015_v47 = vsel %vm493_vm1, %v4687_v42, %v3653_v45  ;;  %v3777_v42 = vld [vmem:[%s4906_s10 + $0x84] ss:$8 sps:$4 sm:$0xff]  }
0x13f8   :  { %v2262_v54 = vpack.c.bf16 %v2244_v46, %v2015_v47  ;;  %2515 = vmatprep.subr.bf16.mxu1 %v3777_v42  ;;  %v3805_v15 = vld [vmem:[#allocation11 + $0xd8] sm:$0xff]   ;;  %v3807_v46 = vld [vmem:[#allocation11 + $0xe0] sm:$0xff]  }
0x13f9   :  { %2516 = vmatpush1.bf16.msra.mxu1 %v3775_v63  ;;  %v3806_v45 = vld [vmem:[#allocation11 + $0x98] sm:$0xff]   ;;  %v3808_v47 = vld [vmem:[#allocation11 + $0xa0] sm:$0xff]  }
0x13fa   :  { %3583 = vmatmul.mubr.bf16.vlgmr.msra.gmra.mrb[32].mxu0 %v2262_v54  ;;  %2517 = vmatprep.subr.bf16.mxu1 %v3780_v22  ;;  %v3809_v54 = vld [vmem:[#allocation11 + $0xe8] sm:$0xff]  }
0x13fb   :  { %3371 = vmatpush3.bf16.msra.mxu0 %v3800_v40 }
0x13fc   :  { %3372 = vmatprep.subr.bf16.mxu0 %v3801_v43 }
0x13ff   :  { %3373 = vmatpush3.bf16.msra.mxu0 %v3802_v44 }
0x1400   :  { %3374 = vmatprep.subr.bf16.mxu0 %v3803_v14 }
0x1403   :  { %3375 = vmatpush3.bf16.msra.mxu0 %v3804_v16  ;;  %v3242_v16 = vld [vmem:[#allocation13 + $0x1] ss:$0 sm:$0xff] }
0x1404   :  { %3376 = vmatprep.subr.bf16.mxu0 %v3805_v15 }
0x1407   :  { %3377 = vmatpush3.bf16.msra.mxu0 %v3806_v45 }
0x1408   :  { %3378 = vmatprep.subr.bf16.mxu0 %v3807_v46 }
0x140b   :  { %3379 = vmatpush3.bf16.msra.mxu0 %v3808_v47 }
0x140c   :  { %3380 = vmatprep.subr.bf16.mxu0 %v3809_v54 }
0x14cd   :  { %v2353_v57 = vpop.f32.mrb[32].mxu0 }
0x14ce   :  { %v2354_v49 = vadd.f32 %v3198_v41, %v2353_v57  ;;  %v3584_v52 = vpop.f32.mrb[33].mxu0  ;;  %v3811_v57 = vld [vmem:[#allocation11 + $0xf0] sm:$0xff]  }
0x14cf   :  { %v2356_v53 = vpop.f32.mrb[34].mxu0  ;;  %v3813_v52 = vld [vmem:[#allocation11 + $0xf8] sm:$0xff]  }
0x14d0   :  { %v2357_v56 = vadd.f32 %v3198_v41, %v2356_v53  ;;  %v3585_v58 = vpop.f32.mrb[35].mxu0  ;;  %v2360_v60 = vadd.f32 %v2354_v49, %v4629_v32  ;;  %v3778_v32 = vld [vmem:[%s4906_s10 + $0x90] ss:$8 sps:$4 sm:$0xff]   ;;  %v3814_v53 = vld [vmem:[#allocation11 + $0xb8] sm:$0xff]  }
0x14d1   :  { %2518 = vmatpush1.bf16.msra.mxu1 %v3778_v32  ;;  %v3810_v41 = vld [vmem:[#allocation11 + $0xa8] sm:$0xff]   ;;  %v3812_v49 = vld [vmem:[#allocation11 + $0xb0] sm:$0xff]  }
0x14d2   :  { %2366 = vadd.xlane.f32.xlu1 %v2360_v60  ;;  %v2361_v61 = vadd.f32 %v2357_v56, %v4631_v33  ;;  %2519 = vmatprep.subr.bf16.mxu1 %v3783_v8  ;;  %v3225_v56 = vld [vmem:[%s4907_s11 + $0x2] sm:$0x3] }
0x14d3   :  { %3381 = vmatpush3.bf16.msra.mxu0 %v3810_v41  ;;  %v2428_v58 = vrot.slane %v3225_v56, %v4435_v59 }
0x14d4   :  { %2368 = vadd.xlane.f32.xlu0 %v2361_v61  ;;  %3382 = vmatprep.subr.bf16.mxu0 %v3811_v57 }
0x14d5   :  { %2520 = vmatpush1.bf16.msra.mxu1 %v3781_v9 }
0x14d6   :  { %2521 = vmatprep.subr.bf16.mxu1 %v3786_v10 }
0x14d7   :  { %3383 = vmatpush3.bf16.msra.mxu0 %v3812_v49 }
0x14d8   :  { %3384 = vmatprep.subr.bf16.mxu0 %v3813_v52 }
0x14d9   :  { %2522 = vmatpush1.bf16.msra.mxu1 %v3784_v11 }
0x14da   :  { %2523 = vmatprep.subr.bf16.mxu1 %v3789_v12 }
0x14db   :  { %3385 = vmatpush3.bf16.msra.mxu0 %v3814_v53  ;;  %v3815_v53 = vld [vmem:[%s4912_s16] sm:$0xff]  }
0x14dc   :  { %3606 = vmatprep.subr.bf16.mxu0 %v4148_v4 }
0x14dd   :  { %2524 = vmatpush1.bf16.msra.mxu1 %v3787_v13 }
0x14de   :  { %2525 = vmatprep.subr.bf16.mxu1 %v3792_v5 }
0x14e1   :  { %2526 = vmatpush1.bf16.msra.mxu1 %v3790_v17 }
0x14e2   :  { %2527 = vmatprep.subr.bf16.mxu1 %v3795_v18 }
0x14e5   :  { %2528 = vmatpush1.bf16.msra.mxu1 %v3793_v19 }
0x14e6   :  { %2529 = vmatprep.subr.bf16.mxu1 %v3798_v20 }
0x14e9   :  { %2530 = vmatpush1.bf16.msra.mxu1 %v3796_v21 }
0x14ea   :  { %3586 = vmatprep.subr.bf16.mxu1 %v4148_v4 }
0x155f   :  { %v2367_v33 = vpop.xlane.xlu1 %2366 }
0x1560   :  { %v2370_v0 = vmul.f32 0.0078125, %v2367_v33 }
0x1561   :  { %v2369_v1 = vpop.xlane.xlu0 %2368 }
0x1562   :  { %v2372_v2 = vsub.f32 %v2360_v60, %v2370_v0  ;;  %v2371_v3 = vmul.f32 0.0078125, %v2369_v1  ;;  %v2432_v60 = vrot.slane %v3225_v56, %v4427_v55 }
0x1564   :  { %v2373_v48 = vsub.f32 %v2361_v61, %v2371_v3  ;;  %v2374_v6 = vmul.f32 %v2372_v2, %v2372_v2 }
0x1566   :  { %2376 = vadd.xlane.f32.xlu0 %v2374_v6  ;;  %v2375_v7 = vmul.f32 %v2373_v48, %v2373_v48 }
0x1568   :  { %2378 = vadd.xlane.f32.xlu1 %v2375_v7 }
0x15f3   :  { %v2377_v23 = vpop.xlane.xlu0 %2376 }
0x15f4   :  { %v2380_v24 = vmul.f32 0.0078125, %v2377_v23 }
0x15f5   :  { %v2379_v25 = vpop.xlane.xlu1 %2378 }
0x15f6   :  { %v2382_v26 = vadd.f32 1e-05, %v2380_v24  ;;  %v2381_v30 = vmul.f32 0.0078125, %v2379_v25 }
0x15f8   :  { %3883 = vrsqrt.f32 %v2382_v26  ;;  %v2383_v27 = vadd.f32 1e-05, %v2381_v30 }
0x15fa   :  { %3885 = vrsqrt.f32 %v2383_v27 }
0x1602   :  { %v3884_v28 = vpop.eup %3883 }
0x1603   :  { %v2386_v31 = vmul.f32 %v3884_v28, %v2372_v2 }
0x1604   :  { %v3886_v34 = vpop.eup %3885 }
0x1605   :  { %v2387_v35 = vmul.f32 %v3886_v34, %v2373_v48  ;;  %v2394_v62 = vmul.f32 %v3207_v29, %v2386_v31 }
0x1607   :  { %v2395_v50 = vmul.f32 %v3207_v29, %v2387_v35  ;;  %v4798_v51 = vadd.f32 %v3208_v36, %v2394_v62 }
0x1609   :  { %v4800_v37 = vadd.f32 %v3208_v36, %v2395_v50 }
0x160b   :  { %v2421_v38 = vpack.c.bf16 %v4800_v37, %v4798_v51 }
0x160d   :  { %2548 = vmatmul.mubr.bf16.vlgmr.msra.gmra.mrb[60].mxu1 %v2421_v38 }
0x160e   :  { %3602 = vmatprep.mubr.msk.bf16.mxu1 %vm4150_vm0, %v4148_v4  ;;  %3587 = vmatpush3.bf16.msra.mxu1 %v3815_v53 }
0x160f   :  { %3588 = vmatprep.subr.bf16.mxu1 %v4148_v4 }
0x16e0   :  { %v2549_v61 = vpop.f32.mrb[60].mxu1 }
0x16e1   :  { %v2550_v63 = vadd.f32 %v2549_v61, %v2428_v58  ;;  %v2551_v42 = vpop.f32.mrb[61].mxu1 }
0x16e2   :  { %v2552_v22 = vadd.f32 %v2551_v42, %v2432_v60  ;;  %v2553_v32 = vpop.f32.mrb[62].mxu1 }
0x16e3   :  { %v2558_v33 = vmul.f32 %v2550_v63, %v2550_v63  ;;  %v2554_v0 = vadd.f32 %v2553_v32, %v2428_v58  ;;  %v2555_v1 = vpop.f32.mrb[63].mxu1  ;;  %v3817_v32 = vld [vmem:[%s4912_s16 + $0x10] sm:$0xff]  }
0x16e4   :  { %v2559_v2 = vmul.f32 %v2552_v22, %v2552_v22  ;;  %v2556_v3 = vadd.f32 %v2555_v1, %v2432_v60  ;;  %v3820_v1 = vld [vmem:[%s4912_s16 + $0x28] sm:$0xff]  }
0x16e5   :  { %v2562_v48 = vmul.f32 %v2558_v33, %v2550_v63  ;;  %v2560_v6 = vmul.f32 %v2554_v0, %v2554_v0  ;;  %v3818_v33 = vld [vmem:[%s4912_s16 + $0x18] sm:$0xff]  }
0x16e6   :  { %v2563_v7 = vmul.f32 %v2559_v2, %v2552_v22  ;;  %v2561_v8 = vmul.f32 %v2556_v3, %v2556_v3  ;;  %v3821_v2 = vld [vmem:[%s4912_s16 + $0x30] sm:$0xff]  }
0x16e7   :  { %v2566_v9 = vmul.f32 0.044715, %v2562_v48  ;;  %v2564_v10 = vmul.f32 %v2560_v6, %v2554_v0  ;;  %v3823_v48 = vld [vmem:[%s4914_s18] sm:$0xff]   ;;  %v3824_v6 = vld [vmem:[%s4914_s18 + $0x8] sm:$0xff]  }
0x16e8   :  { %v2567_v11 = vmul.f32 0.044715, %v2563_v7  ;;  %v2565_v59 = vmul.f32 %v2561_v8, %v2556_v3  ;;  %v3825_v7 = vld [vmem:[%s4914_s18 + $0x10] sm:$0xff]   ;;  %v3826_v8 = vld [vmem:[%s4914_s18 + $0x18] sm:$0xff]  }
0x16e9   :  { %v2570_v12 = vadd.f32 %v2566_v9, %v2550_v63  ;;  %v2568_v55 = vmul.f32 0.044715, %v2564_v10 }
0x16ea   :  { %v2571_v13 = vadd.f32 %v2567_v11, %v2552_v22  ;;  %v2569_v5 = vmul.f32 0.044715, %v2565_v59 }
0x16eb   :  { %v2574_v17 = vmul.f32 0.7978846, %v2570_v12  ;;  %v2572_v18 = vadd.f32 %v2568_v55, %v2554_v0 }
0x16ec   :  { %v2575_v19 = vmul.f32 0.7978846, %v2571_v13  ;;  %v2573_v20 = vadd.f32 %v2569_v5, %v2556_v3 }
0x16ed   :  { %3887 = vtanh.f32 %v2574_v17  ;;  %v2576_v21 = vmul.f32 0.7978846, %v2572_v18  ;;  %v3260_v18 = vld [vmem:[%s4910_s14 + $0x1] ss:$0 sm:$0xff] }
0x16ee   :  { %3889 = vtanh.f32 %v2575_v19  ;;  %v2577_v23 = vmul.f32 0.7978846, %v2573_v20 }
0x16ef   :  { %3891 = vtanh.f32 %v2576_v21 }
0x16f0   :  { %3893 = vtanh.f32 %v2577_v23  ;;  %v3261_v23 = vld [vmem:[#allocation14 + $0x1] ss:$0 sm:$0xff] }
0x16f7   :  { %v3888_v24 = vpop.eup %3887 }
0x16f8   :  { %v3890_v25 = vpop.eup %3889  ;;  %v2582_v26 = vadd.f32 1.0, %v3888_v24 }
0x16f9   :  { %v3892_v30 = vpop.eup %3891  ;;  %v2583_v27 = vadd.f32 1.0, %v3890_v25 }
0x16fa   :  { %v3894_v28 = vpop.eup %3893  ;;  %v2586_v29 = vmul.f32 0.5, %v2582_v26  ;;  %v2584_v31 = vadd.f32 1.0, %v3892_v30 }
0x16fb   :  { %v2585_v34 = vadd.f32 1.0, %v3894_v28  ;;  %v2587_v35 = vmul.f32 0.5, %v2583_v27  ;;  %v3827_v28 = vld [vmem:[%s4914_s18 + $0x20] sm:$0xff]  }
0x16fc   :  { %v2588_v62 = vmul.f32 0.5, %v2584_v31  ;;  %v2590_v50 = vmul.f32 %v2586_v29, %v2550_v63  ;;  %v3828_v29 = vld [vmem:[%s4914_s18 + $0x28] sm:$0xff]   ;;  %v3829_v31 = vld [vmem:[%s4914_s18 + $0x30] sm:$0xff]  }
0x16fd   :  { %v2589_v36 = vmul.f32 0.5, %v2585_v34  ;;  %v2591_v39 = vmul.f32 %v2587_v35, %v2552_v22  ;;  %v3830_v34 = vld [vmem:[%s4914_s18 + $0x38] sm:$0xff]   ;;  %v3262_v35 = vld [vmem:[%s4933_s2] ss:$0 sm:$0xff]  ;;  %s4099_s18 = scalar_lea.vmem %s3057_s21, 32 }
0x16fe   :  { %v2592_v38 = vmul.f32 %v2588_v62, %v2554_v0  ;;  %v3819_v0 = vld [vmem:[%s4912_s16 + $0x20] sm:$0xff]   ;;  %p4100_p2 = scmp.ne.s32.totalorder %s3057_s21, %s4099_s18  ;;  %p4105_p4 = scmp.lt.s32.totalorder %s4099_s18, %s4099_s18 }
0x16ff   :  { %v2593_v40 = vmul.f32 %v2589_v36, %v2556_v3  ;;  %v3822_v3 = vld [vmem:[%s4912_s16 + $0x38] sm:$0xff]  }
0x1700   :  { %v2627_v43 = vpack.c.bf16 %v2592_v38, %v2590_v50  ;;  %p4106_p5 = por %p4105_p4, %p4104_p3 }
0x1701   :  { %v2628_v44 = vpack.c.bf16 %v2593_v40, %v2591_v39 }
0x1702   :  { %p4107_p6 = pnand %p4106_p5, %p4100_p2 }
0x1703   :  { %2765 = vmatprep.mubr.bf16.mxu0 %v2628_v44  ;;  %v3271_v44 = vld [vmem:[#allocation16] ss:$0 sm:$0xff] }
0x1704   :  { %2766 = vmatmul.mubr.bf16.vlgmr.msra.gmra.mrb[36].mxu0 %v2627_v43 }
0x1705   :  { %3622 = vmatprep.mubr.msk.bf16.mxu0 %vm4150_vm0, %v4148_v4  ;;  %3607 = vmatpush3.bf16.msra.mxu0 %v3823_v48 }
0x1706   :  { %3608 = vmatprep.subr.bf16.mxu0 %v4148_v4 }
0x1709   :  { %3609 = vmatpush3.bf16.msra.mxu0 %v3824_v6 }
0x170a   :  { %3610 = vmatprep.subr.bf16.mxu0 %v4148_v4 }
0x170d   :  { %3611 = vmatpush3.bf16.msra.mxu0 %v3825_v7 }
0x170e   :  { %3612 = vmatprep.subr.bf16.mxu0 %v4148_v4 }
0x1711   :  { %3613 = vmatpush3.bf16.msra.mxu0 %v3826_v8 }
0x1712   :  { %3614 = vmatprep.subr.bf16.mxu0 %v4148_v4 }
0x1715   :  { %3615 = vmatpush3.bf16.msra.mxu0 %v3827_v28 }
0x1716   :  { %3616 = vmatprep.subr.bf16.mxu0 %v4148_v4 }
0x1719   :  { %3617 = vmatpush3.bf16.msra.mxu0 %v3828_v29 }
0x171a   :  { %3618 = vmatprep.subr.bf16.mxu0 %v4148_v4 }
0x171d   :  { %3619 = vmatpush3.bf16.msra.mxu0 %v3829_v31 }
0x171e   :  { %3620 = vmatprep.subr.bf16.mxu0 %v4148_v4 }
0x1721   :  { %3621 = vmatpush3.bf16.msra.mxu0 %v3830_v34 }
0x17d7   :  { %v3386_v14 = vpop.f32.mrb[36].mxu0 }
0x17d8   :  { %v3387_v15 = vpop.f32.mrb[37].mxu0 }
0x17d9   :  { %v3388_v45 = vadd.f32 %v3387_v15, %v3386_v14  ;;  %v3389_v46 = vpop.f32.mrb[38].mxu0 }
0x17da   :  { %v3390_v47 = vpop.f32.mrb[39].mxu0 }
0x17db   :  { %v2768_v54 = vadd.f32 %v3388_v45, %v3242_v16  ;;  %v3391_v41 = vadd.f32 %v3390_v47, %v3389_v46 }
0x17dd   :  { %v2771_v57 = vadd.f32 %v3391_v41, %v3242_v16  ;;  %v2774_v49 = vadd.f32 %v2768_v54, %v4798_v51 }
0x17df   :  { %2780 = vadd.xlane.f32.xlu1 %v2774_v49  ;;  %v2775_v52 = vadd.f32 %v2771_v57, %v4800_v37  ;;  %v3816_v37 = vld [vmem:[%s4912_s16 + $0x8] sm:$0xff]  }
0x17e0   :  { %3589 = vmatpush3.bf16.msra.mxu1 %v3816_v37 }
0x17e1   :  { %2782 = vadd.xlane.f32.xlu0 %v2775_v52  ;;  %3590 = vmatprep.subr.bf16.mxu1 %v4148_v4 }
0x17e4   :  { %3591 = vmatpush3.bf16.msra.mxu1 %v3817_v32 }
0x17e5   :  { %3592 = vmatprep.subr.bf16.mxu1 %v4148_v4 }
0x17e8   :  { %3593 = vmatpush3.bf16.msra.mxu1 %v3818_v33 }
0x17e9   :  { %3594 = vmatprep.subr.bf16.mxu1 %v4148_v4 }
0x17ec   :  { %3595 = vmatpush3.bf16.msra.mxu1 %v3819_v0 }
0x17ed   :  { %3596 = vmatprep.subr.bf16.mxu1 %v4148_v4 }
0x17f0   :  { %3597 = vmatpush3.bf16.msra.mxu1 %v3820_v1 }
0x17f1   :  { %3598 = vmatprep.subr.bf16.mxu1 %v4148_v4 }
0x17f4   :  { %3599 = vmatpush3.bf16.msra.mxu1 %v3821_v2 }
0x17f5   :  { %3600 = vmatprep.subr.bf16.mxu1 %v4148_v4 }
0x17f8   :  { %3601 = vmatpush3.bf16.msra.mxu1 %v3822_v3 }
0x186c   :  { %v2781_v56 = vpop.xlane.xlu1 %2780 }
0x186d   :  { %v2784_v58 = vmul.f32 0.0078125, %v2781_v56 }
0x186e   :  { %v2783_v60 = vpop.xlane.xlu0 %2782 }
0x186f   :  { %v2786_v61 = vsub.f32 %v2774_v49, %v2784_v58  ;;  %v2785_v63 = vmul.f32 0.0078125, %v2783_v60 }
0x1871   :  { %v2787_v42 = vsub.f32 %v2775_v52, %v2785_v63  ;;  %v2788_v22 = vmul.f32 %v2786_v61, %v2786_v61 }
0x1873   :  { %2790 = vadd.xlane.f32.xlu1 %v2788_v22  ;;  %v2789_v51 = vmul.f32 %v2787_v42, %v2787_v42 }
0x1875   :  { %2792 = vadd.xlane.f32.xlu0 %v2789_v51 }
0x1900   :  { %v2791_v9 = vpop.xlane.xlu1 %2790 }
0x1901   :  { %v2794_v10 = vmul.f32 0.0078125, %v2791_v9 }
0x1902   :  { %v2793_v11 = vpop.xlane.xlu0 %2792 }
0x1903   :  { %v2796_v59 = vadd.f32 1e-05, %v2794_v10  ;;  %v2795_v12 = vmul.f32 0.0078125, %v2793_v11 }
0x1905   :  { %3895 = vrsqrt.f32 %v2796_v59  ;;  %v2797_v55 = vadd.f32 1e-05, %v2795_v12 }
0x1907   :  { %3897 = vrsqrt.f32 %v2797_v55 }
0x190f   :  { %v3896_v13 = vpop.eup %3895 }
0x1910   :  { %v2800_v5 = vmul.f32 %v3896_v13, %v2786_v61 }
0x1911   :  { %v3898_v17 = vpop.eup %3897 }
0x1912   :  { %v2801_v19 = vmul.f32 %v3898_v17, %v2787_v42  ;;  %v2808_v20 = vmul.f32 %v3260_v18, %v2800_v5 }
0x1914   :  { %v2809_v21 = vmul.f32 %v3260_v18, %v2801_v19  ;;  %v2816_v25 = vadd.f32 %v3261_v23, %v2808_v20 }
0x1916   :  { %v2817_v24 = vadd.f32 %v3261_v23, %v2809_v21 }
0x1918   :  { %v2819_v26 = vrot.slane %v2817_v24, 7 }
0x191a   :  { %v2822_v30 = vsel %vm2821_vm4, %v2816_v25, %v2819_v26 }
0x191b   :  { %v2839_v27 = vpack.c.bf16 %v2822_v30, %v2822_v30 }
0x191d   :  { %3603 = vmatmul.mubr.bf16.vlgmr.msra.gmra.mrb[64].mxu1 %v2839_v27 }
0x19f0   :  { %v2929_v62 = vpop.f32.mrb[64].mxu1 }
0x19f1   :  { %v2930_v36 = vadd.f32 %v3262_v35, %v2929_v62  ;;  %v3604_v50 = vpop.f32.mrb[65].mxu1 }
0x19f2   :  { %v2932_v38 = vpop.f32.mrb[66].mxu1 }
0x19f3   :  { %3899 = vtanh.f32 %v2930_v36  ;;  %v3605_v39 = vpop.f32.mrb[67].mxu1 }
0x19fd   :  { %v3900_v40 = vpop.eup %3899 }
0x19fe   :  { %v2952_v43 = vpack.c.bf16 %v3900_v40, %v3900_v40 }
0x1a00   :  { %3623 = vmatmul.mubr.bf16.vlgmr.msra.gmra.mrb[40].mxu0 %v2952_v43 }
0x1ad3   :  { %v3042_v4 = vpop.f32.mrb[40].mxu0 }
0x1ad4   :  { %v3043_v14 = vadd.f32 %v3271_v44, %v3042_v4  ;;  %v3624_v16 = vpop.f32.mrb[41].mxu0 }
0x1ad5   :  { %v3045_v15 = vpop.f32.mrb[42].mxu0 }
0x1ad6   :  { %v3625_v45 = vpop.f32.mrb[43].mxu0  ;;  %3049 = vst.msk [vmem:[#allocation17] sm:$0x3] %vm3048_vm5, %v3043_v14 }
0x1ad7   :  { %4110 = shalt.err (!%p4107_p6)
}
0x1ad8   :  { %s4934_s15 = sld [smem:[#allocation30_spill]] }
0x1ade   :  { %s4111_s19 = scalar_lea.hbm %s4934_s15, 32 }
0x1adf   :  { %p4112_p7 = scmp.ne.s32.totalorder %s4934_s15, %s4111_s19  ;;  %p4115_p8 = scmp.lt.u32.totalorder %s4111_s19, %s4934_s15 }
0x1ae1   :  { %p4117_p9 = pnand %p4115_p8, %p4112_p7 }
0x1ae3   :  { %4120 = shalt.err (!%p4117_p9)
}
0x1ae4   :  { %3059 = dma.vmem_to_hbm [thread:$0]  %s3057_s21, 32, %s4934_s15, [#allocation4]  }
0x1ae5   :  { %4131 = dma.done.wait [#allocation4], 32  }
0x1ae6   :  { %4132 = vsyncadd [#allocation4], 4294967264 }
0x1ae7   :  { %3063 = vsyncpa [#allocation3], 1 }
0x1ae8   :  { %3064 = vsyncpa [#allocation6], 1 }
0x1ae9   :  { %3065 = vsyncpa [#allocation9], 1 }
0x1aea   :  { %3066 = vsyncpa [#allocation12], 1 }
0x1aeb   :  { %3067 = vsyncpa [#allocation15], 1 }
0x1aec   :  { %3068 = vsyncpa [#allocation4], 1 }

</bundles_post_ra>
